<compile_context>
chip_gen: v6e
topology: v6e:2x2x1
jax: 0.10.0
libtpu: 0.0.40
codegen_flags: <defaults>
</compile_context>

<pallas_src>
import functools

import jax
import jax.numpy as jnp
from jax.experimental import pallas as pl
from jax.experimental.pallas import tpu as pltpu


def _conv1x1_relu_sub_kernel(w_ref, b_ref, x_ref, o_ref, *, c_in, c_out, sub):
    # w_ref: SMEM (c_out, c_in)   scalar weights
    # b_ref: SMEM (c_out,)        scalar bias
    # x_ref: VMEM (c_in, TR, Wp)  padded-input slab; rows on sublanes, cols on lanes
    # o_ref: VMEM (c_out, TR, Wp) final padded-output slab
    xs = [x_ref[ci] for ci in range(c_in)]            # dense (TR, Wp) slabs
    for co in range(c_out):
        acc = xs[0] * w_ref[co, 0]
        for ci in range(1, c_in):
            acc = acc + xs[ci] * w_ref[co, ci]
        y = jnp.maximum(acc + b_ref[co], 0.0) - jnp.float32(sub)
        o_ref[co] = y.astype(o_ref.dtype)


def _pick_row_tile(hp, wp, c_in, c_out, itemsize, budget_bytes=4 << 20):
    """Rows per grid step: multiple of 8 (sublane rule) or the full padded height."""
    bytes_per_row = wp * (c_in + c_out) * itemsize
    tr = max(8, budget_bytes // bytes_per_row)
    if tr >= hp:
        return hp, 1                      # whole padded image per grid step
    tr -= tr % 8                          # keep the sublane dim 8-aligned
    rb = -(-hp // tr)                     # trailing block may be partial:
    return tr, rb                         # OOB input reads are ignored, OOB writes dropped


def conv1x1_relu_sub(x_nchw, weight, bias, *, sub=0.234):
    """PyTorch Conv2d(C_in, C_out, 1, stride=1, padding=1) -> ReLU -> (y - sub).

    x_nchw: (N, C_in, H, W); weight: (C_out, C_in, 1, 1); bias: (C_out,).
    Returns (N, C_out, H + 2, W + 2), matching the PyTorch module.
    """
    N, C_in, H, W = x_nchw.shape
    C_out = weight.shape[0]
    Hp, Wp = H + 2, W + 2

    # Zero padding (padding=1, padding_mode='zeros') done once on the small
    # C_in-channel input; the 1x1 conv is then pointwise over padded pixels,
    # so the kernel emits the final padded output directly in one pass.
    x_pad = jnp.pad(x_nchw, ((0, 0), (0, 0), (1, 1), (1, 1)))
    w2d = weight.reshape(C_out, C_in)
    b1d = bias.reshape(C_out)

    TR, RB = _pick_row_tile(Hp, Wp, C_in, C_out, x_nchw.dtype.itemsize)
    grid = (N, RB)

    kernel = functools.partial(
        _conv1x1_relu_sub_kernel, c_in=C_in, c_out=C_out, sub=sub)

    return pl.pallas_call(
        kernel,
        out_shape=jax.ShapeDtypeStruct((N, C_out, Hp, Wp), x_nchw.dtype),
        grid_spec=pl.GridSpec(
            grid=grid,
            in_specs=[
                pl.BlockSpec(memory_space=pltpu.MemorySpace.SMEM),   # weights (C_out, C_in)
                pl.BlockSpec(memory_space=pltpu.MemorySpace.SMEM),   # bias (C_out,)
                pl.BlockSpec((None, C_in, TR, Wp), lambda n, r: (n, 0, r, 0)),
            ],
            out_specs=pl.BlockSpec((None, C_out, TR, Wp), lambda n, r: (n, 0, r, 0)),
        ),
        compiler_params=pltpu.CompilerParams(
            dimension_semantics=("parallel", "parallel"),
            vmem_limit_bytes=32 << 20),
    )(w2d, b1d, x_pad)


if __name__ == "__main__":
    key = jax.random.PRNGKey(0)
    kx, kw, kb = jax.random.split(key, 3)

    # module fixes C_in=3, C_out=8; spec spatial size is 64x64
    N, C_in, H, W = 2, 3, 64, 64
    C_out = 8

    x = jax.random.normal(kx, (N, C_in, H, W), dtype=jnp.float32)
    weight = jax.random.normal(kw, (C_out, C_in, 1, 1), dtype=jnp.float32) * 0.1
    bias = jax.random.normal(kb, (C_out,), dtype=jnp.float32) * 0.1

    out = jax.jit(conv1x1_relu_sub)(x, weight, bias)
    jax.block_until_ready(out)

    # pure-JAX reference (conv with zero padding=1, relu, subtract)
    x_pad = jnp.pad(x, ((0, 0), (0, 0), (1, 1), (1, 1)))
    ref = jnp.einsum('nchw,oc->nohw', x_pad, weight.reshape(C_out, C_in))
    ref = jnp.maximum(ref + bias[None, :, None, None], 0.0) - 0.234

    assert out.shape == (N, C_out, H + 2, W + 2), out.shape
    assert jnp.allclose(out, ref, atol=1e-5), float(jnp.max(jnp.abs(out - ref)))

    print("KERNEL_OK")
</pallas_src>

<mosaic_0001>
module attributes {stable_mosaic.version = 11 : i64} {
  func.func @_conv1x1_relu_sub_kernel(%arg0: i32, %arg1: i32, %arg2: memref<8x3xf32, #tpu.memory_space<smem>>, %arg3: memref<8xf32, #tpu.memory_space<smem>>, %arg4: memref<1x3x66x66xf32, #tpu.memory_space<vmem>>, %arg5: memref<1x8x66x66xf32, #tpu.memory_space<vmem>>) attributes {dimension_semantics = [#tpu.dimension_semantics<parallel>, #tpu.dimension_semantics<parallel>], iteration_bounds = array<i64: 2, 1>, scalar_prefetch = 0 : i64, scratch_operands = 0 : i64, tpu.core_type = #tpu.core_type<tc>, window_params = [{transform_indices = @transform_0, window_bounds = array<i64: 8, 3>}, {transform_indices = @transform_1, window_bounds = array<i64: 8>}, {transform_indices = @transform_2, window_bounds = array<i64: 1, 3, 66, 66>}, {transform_indices = @transform_3, window_bounds = array<i64: 1, 8, 66, 66>}]} {
    %c0 = arith.constant 0 : index
    %c0_0 = arith.constant 0 : index
    %c0_1 = arith.constant 0 : index
    %c0_2 = arith.constant 0 : index
    %0 = vector.load %arg4[%c0, %c0_0, %c0_1, %c0_2] : memref<1x3x66x66xf32, #tpu.memory_space<vmem>>, vector<1x1x66x66xf32>
    %1 = vector.shape_cast %0 : vector<1x1x66x66xf32> to vector<66x66xf32>
    %c0_3 = arith.constant 0 : index
    %c1 = arith.constant 1 : index
    %c0_4 = arith.constant 0 : index
    %c0_5 = arith.constant 0 : index
    %2 = vector.load %arg4[%c0_3, %c1, %c0_4, %c0_5] : memref<1x3x66x66xf32, #tpu.memory_space<vmem>>, vector<1x1x66x66xf32>
    %3 = vector.shape_cast %2 : vector<1x1x66x66xf32> to vector<66x66xf32>
    %c0_6 = arith.constant 0 : index
    %c2 = arith.constant 2 : index
    %c0_7 = arith.constant 0 : index
    %c0_8 = arith.constant 0 : index
    %4 = vector.load %arg4[%c0_6, %c2, %c0_7, %c0_8] : memref<1x3x66x66xf32, #tpu.memory_space<vmem>>, vector<1x1x66x66xf32>
    %5 = vector.shape_cast %4 : vector<1x1x66x66xf32> to vector<66x66xf32>
    %c0_9 = arith.constant 0 : index
    %c0_10 = arith.constant 0 : index
    %6 = memref.load %arg2[%c0_9, %c0_10] : memref<8x3xf32, #tpu.memory_space<smem>>
    %7 = vector.broadcast %6 : f32 to vector<66x66xf32>
    %8 = arith.mulf %1, %7 : vector<66x66xf32>
    %c0_11 = arith.constant 0 : index
    %c1_12 = arith.constant 1 : index
    %9 = memref.load %arg2[%c0_11, %c1_12] : memref<8x3xf32, #tpu.memory_space<smem>>
    %10 = vector.broadcast %9 : f32 to vector<66x66xf32>
    %11 = arith.mulf %3, %10 : vector<66x66xf32>
    %12 = arith.addf %8, %11 : vector<66x66xf32>
    %c0_13 = arith.constant 0 : index
    %c2_14 = arith.constant 2 : index
    %13 = memref.load %arg2[%c0_13, %c2_14] : memref<8x3xf32, #tpu.memory_space<smem>>
    %14 = vector.broadcast %13 : f32 to vector<66x66xf32>
    %15 = arith.mulf %5, %14 : vector<66x66xf32>
    %16 = arith.addf %12, %15 : vector<66x66xf32>
    %c0_15 = arith.constant 0 : index
    %17 = memref.load %arg3[%c0_15] : memref<8xf32, #tpu.memory_space<smem>>
    %18 = vector.broadcast %17 : f32 to vector<66x66xf32>
    %19 = arith.addf %16, %18 : vector<66x66xf32>
    %cst = arith.constant 0.000000e+00 : f32
    %20 = vector.broadcast %cst : f32 to vector<66x66xf32>
    %21 = arith.maximumf %19, %20 : vector<66x66xf32>
    %cst_16 = arith.constant 2.340000e-01 : f32
    %22 = vector.broadcast %cst_16 : f32 to vector<66x66xf32>
    %23 = arith.subf %21, %22 : vector<66x66xf32>
    %c0_17 = arith.constant 0 : index
    %c0_18 = arith.constant 0 : index
    %c0_19 = arith.constant 0 : index
    %c0_20 = arith.constant 0 : index
    %24 = vector.load %arg5[%c0_17, %c0_18, %c0_19, %c0_20] : memref<1x8x66x66xf32, #tpu.memory_space<vmem>>, vector<1x1x66x66xf32>
    %25 = vector.shape_cast %24 : vector<1x1x66x66xf32> to vector<66x66xf32>
    %26 = vector.shape_cast %23 : vector<66x66xf32> to vector<1x1x66x66xf32>
    tpu.vector_store %arg5[%c0_17, %c0_18, %c0_19, %c0_20], %26 {strides = array<i32>} : memref<1x8x66x66xf32, #tpu.memory_space<vmem>>, vector<1x1x66x66xf32>,
    %c1_21 = arith.constant 1 : index
    %c0_22 = arith.constant 0 : index
    %27 = memref.load %arg2[%c1_21, %c0_22] : memref<8x3xf32, #tpu.memory_space<smem>>
    %28 = vector.broadcast %27 : f32 to vector<66x66xf32>
    %29 = arith.mulf %1, %28 : vector<66x66xf32>
    %c1_23 = arith.constant 1 : index
    %c1_24 = arith.constant 1 : index
    %30 = memref.load %arg2[%c1_23, %c1_24] : memref<8x3xf32, #tpu.memory_space<smem>>
    %31 = vector.broadcast %30 : f32 to vector<66x66xf32>
    %32 = arith.mulf %3, %31 : vector<66x66xf32>
    %33 = arith.addf %29, %32 : vector<66x66xf32>
    %c1_25 = arith.constant 1 : index
    %c2_26 = arith.constant 2 : index
    %34 = memref.load %arg2[%c1_25, %c2_26] : memref<8x3xf32, #tpu.memory_space<smem>>
    %35 = vector.broadcast %34 : f32 to vector<66x66xf32>
    %36 = arith.mulf %5, %35 : vector<66x66xf32>
    %37 = arith.addf %33, %36 : vector<66x66xf32>
    %c1_27 = arith.constant 1 : index
    %38 = memref.load %arg3[%c1_27] : memref<8xf32, #tpu.memory_space<smem>>
    %39 = vector.broadcast %38 : f32 to vector<66x66xf32>
    %40 = arith.addf %37, %39 : vector<66x66xf32>
    %cst_28 = arith.constant 0.000000e+00 : f32
    %41 = vector.broadcast %cst_28 : f32 to vector<66x66xf32>
    %42 = arith.maximumf %40, %41 : vector<66x66xf32>
    %cst_29 = arith.constant 2.340000e-01 : f32
    %43 = vector.broadcast %cst_29 : f32 to vector<66x66xf32>
    %44 = arith.subf %42, %43 : vector<66x66xf32>
    %c0_30 = arith.constant 0 : index
    %c1_31 = arith.constant 1 : index
    %c0_32 = arith.constant 0 : index
    %c0_33 = arith.constant 0 : index
    %45 = vector.load %arg5[%c0_30, %c1_31, %c0_32, %c0_33] : memref<1x8x66x66xf32, #tpu.memory_space<vmem>>, vector<1x1x66x66xf32>
    %46 = vector.shape_cast %45 : vector<1x1x66x66xf32> to vector<66x66xf32>
    %47 = vector.shape_cast %44 : vector<66x66xf32> to vector<1x1x66x66xf32>
    tpu.vector_store %arg5[%c0_30, %c1_31, %c0_32, %c0_33], %47 {strides = array<i32>} : memref<1x8x66x66xf32, #tpu.memory_space<vmem>>, vector<1x1x66x66xf32>,
    %c2_34 = arith.constant 2 : index
    %c0_35 = arith.constant 0 : index
    %48 = memref.load %arg2[%c2_34, %c0_35] : memref<8x3xf32, #tpu.memory_space<smem>>
    %49 = vector.broadcast %48 : f32 to vector<66x66xf32>
    %50 = arith.mulf %1, %49 : vector<66x66xf32>
    %c2_36 = arith.constant 2 : index
    %c1_37 = arith.constant 1 : index
    %51 = memref.load %arg2[%c2_36, %c1_37] : memref<8x3xf32, #tpu.memory_space<smem>>
    %52 = vector.broadcast %51 : f32 to vector<66x66xf32>
    %53 = arith.mulf %3, %52 : vector<66x66xf32>
    %54 = arith.addf %50, %53 : vector<66x66xf32>
    %c2_38 = arith.constant 2 : index
    %c2_39 = arith.constant 2 : index
    %55 = memref.load %arg2[%c2_38, %c2_39] : memref<8x3xf32, #tpu.memory_space<smem>>
    %56 = vector.broadcast %55 : f32 to vector<66x66xf32>
    %57 = arith.mulf %5, %56 : vector<66x66xf32>
    %58 = arith.addf %54, %57 : vector<66x66xf32>
    %c2_40 = arith.constant 2 : index
    %59 = memref.load %arg3[%c2_40] : memref<8xf32, #tpu.memory_space<smem>>
    %60 = vector.broadcast %59 : f32 to vector<66x66xf32>
    %61 = arith.addf %58, %60 : vector<66x66xf32>
    %cst_41 = arith.constant 0.000000e+00 : f32
    %62 = vector.broadcast %cst_41 : f32 to vector<66x66xf32>
    %63 = arith.maximumf %61, %62 : vector<66x66xf32>
    %cst_42 = arith.constant 2.340000e-01 : f32
    %64 = vector.broadcast %cst_42 : f32 to vector<66x66xf32>
    %65 = arith.subf %63, %64 : vector<66x66xf32>
    %c0_43 = arith.constant 0 : index
    %c2_44 = arith.constant 2 : index
    %c0_45 = arith.constant 0 : index
    %c0_46 = arith.constant 0 : index
    %66 = vector.load %arg5[%c0_43, %c2_44, %c0_45, %c0_46] : memref<1x8x66x66xf32, #tpu.memory_space<vmem>>, vector<1x1x66x66xf32>
    %67 = vector.shape_cast %66 : vector<1x1x66x66xf32> to vector<66x66xf32>
    %68 = vector.shape_cast %65 : vector<66x66xf32> to vector<1x1x66x66xf32>
    tpu.vector_store %arg5[%c0_43, %c2_44, %c0_45, %c0_46], %68 {strides = array<i32>} : memref<1x8x66x66xf32, #tpu.memory_space<vmem>>, vector<1x1x66x66xf32>,
    %c3 = arith.constant 3 : index
    %c0_47 = arith.constant 0 : index
    %69 = memref.load %arg2[%c3, %c0_47] : memref<8x3xf32, #tpu.memory_space<smem>>
    %70 = vector.broadcast %69 : f32 to vector<66x66xf32>
    %71 = arith.mulf %1, %70 : vector<66x66xf32>
    %c3_48 = arith.constant 3 : index
    %c1_49 = arith.constant 1 : index
    %72 = memref.load %arg2[%c3_48, %c1_49] : memref<8x3xf32, #tpu.memory_space<smem>>
    %73 = vector.broadcast %72 : f32 to vector<66x66xf32>
    %74 = arith.mulf %3, %73 : vector<66x66xf32>
    %75 = arith.addf %71, %74 : vector<66x66xf32>
    %c3_50 = arith.constant 3 : index
    %c2_51 = arith.constant 2 : index
    %76 = memref.load %arg2[%c3_50, %c2_51] : memref<8x3xf32, #tpu.memory_space<smem>>
    %77 = vector.broadcast %76 : f32 to vector<66x66xf32>
    %78 = arith.mulf %5, %77 : vector<66x66xf32>
    %79 = arith.addf %75, %78 : vector<66x66xf32>
    %c3_52 = arith.constant 3 : index
    %80 = memref.load %arg3[%c3_52] : memref<8xf32, #tpu.memory_space<smem>>
    %81 = vector.broadcast %80 : f32 to vector<66x66xf32>
    %82 = arith.addf %79, %81 : vector<66x66xf32>
    %cst_53 = arith.constant 0.000000e+00 : f32
    %83 = vector.broadcast %cst_53 : f32 to vector<66x66xf32>
    %84 = arith.maximumf %82, %83 : vector<66x66xf32>
    %cst_54 = arith.constant 2.340000e-01 : f32
    %85 = vector.broadcast %cst_54 : f32 to vector<66x66xf32>
    %86 = arith.subf %84, %85 : vector<66x66xf32>
    %c0_55 = arith.constant 0 : index
    %c3_56 = arith.constant 3 : index
    %c0_57 = arith.constant 0 : index
    %c0_58 = arith.constant 0 : index
    %87 = vector.load %arg5[%c0_55, %c3_56, %c0_57, %c0_58] : memref<1x8x66x66xf32, #tpu.memory_space<vmem>>, vector<1x1x66x66xf32>
    %88 = vector.shape_cast %87 : vector<1x1x66x66xf32> to vector<66x66xf32>
    %89 = vector.shape_cast %86 : vector<66x66xf32> to vector<1x1x66x66xf32>
    tpu.vector_store %arg5[%c0_55, %c3_56, %c0_57, %c0_58], %89 {strides = array<i32>} : memref<1x8x66x66xf32, #tpu.memory_space<vmem>>, vector<1x1x66x66xf32>,
    %c4 = arith.constant 4 : index
    %c0_59 = arith.constant 0 : index
    %90 = memref.load %arg2[%c4, %c0_59] : memref<8x3xf32, #tpu.memory_space<smem>>
    %91 = vector.broadcast %90 : f32 to vector<66x66xf32>
    %92 = arith.mulf %1, %91 : vector<66x66xf32>
    %c4_60 = arith.constant 4 : index
    %c1_61 = arith.constant 1 : index
    %93 = memref.load %arg2[%c4_60, %c1_61] : memref<8x3xf32, #tpu.memory_space<smem>>
    %94 = vector.broadcast %93 : f32 to vector<66x66xf32>
    %95 = arith.mulf %3, %94 : vector<66x66xf32>
    %96 = arith.addf %92, %95 : vector<66x66xf32>
    %c4_62 = arith.constant 4 : index
    %c2_63 = arith.constant 2 : index
    %97 = memref.load %arg2[%c4_62, %c2_63] : memref<8x3xf32, #tpu.memory_space<smem>>
    %98 = vector.broadcast %97 : f32 to vector<66x66xf32>
    %99 = arith.mulf %5, %98 : vector<66x66xf32>
    %100 = arith.addf %96, %99 : vector<66x66xf32>
    %c4_64 = arith.constant 4 : index
    %101 = memref.load %arg3[%c4_64] : memref<8xf32, #tpu.memory_space<smem>>
    %102 = vector.broadcast %101 : f32 to vector<66x66xf32>
    %103 = arith.addf %100, %102 : vector<66x66xf32>
    %cst_65 = arith.constant 0.000000e+00 : f32
    %104 = vector.broadcast %cst_65 : f32 to vector<66x66xf32>
    %105 = arith.maximumf %103, %104 : vector<66x66xf32>
    %cst_66 = arith.constant 2.340000e-01 : f32
    %106 = vector.broadcast %cst_66 : f32 to vector<66x66xf32>
    %107 = arith.subf %105, %106 : vector<66x66xf32>
    %c0_67 = arith.constant 0 : index
    %c4_68 = arith.constant 4 : index
    %c0_69 = arith.constant 0 : index
    %c0_70 = arith.constant 0 : index
    %108 = vector.load %arg5[%c0_67, %c4_68, %c0_69, %c0_70] : memref<1x8x66x66xf32, #tpu.memory_space<vmem>>, vector<1x1x66x66xf32>
    %109 = vector.shape_cast %108 : vector<1x1x66x66xf32> to vector<66x66xf32>
    %110 = vector.shape_cast %107 : vector<66x66xf32> to vector<1x1x66x66xf32>
    tpu.vector_store %arg5[%c0_67, %c4_68, %c0_69, %c0_70], %110 {strides = array<i32>} : memref<1x8x66x66xf32, #tpu.memory_space<vmem>>, vector<1x1x66x66xf32>,
    %c5 = arith.constant 5 : index
    %c0_71 = arith.constant 0 : index
    %111 = memref.load %arg2[%c5, %c0_71] : memref<8x3xf32, #tpu.memory_space<smem>>
    %112 = vector.broadcast %111 : f32 to vector<66x66xf32>
    %113 = arith.mulf %1, %112 : vector<66x66xf32>
    %c5_72 = arith.constant 5 : index
    %c1_73 = arith.constant 1 : index
    %114 = memref.load %arg2[%c5_72, %c1_73] : memref<8x3xf32, #tpu.memory_space<smem>>
    %115 = vector.broadcast %114 : f32 to vector<66x66xf32>
    %116 = arith.mulf %3, %115 : vector<66x66xf32>
    %117 = arith.addf %113, %116 : vector<66x66xf32>
    %c5_74 = arith.constant 5 : index
    %c2_75 = arith.constant 2 : index
    %118 = memref.load %arg2[%c5_74, %c2_75] : memref<8x3xf32, #tpu.memory_space<smem>>
    %119 = vector.broadcast %118 : f32 to vector<66x66xf32>
    %120 = arith.mulf %5, %119 : vector<66x66xf32>
    %121 = arith.addf %117, %120 : vector<66x66xf32>
    %c5_76 = arith.constant 5 : index
    %122 = memref.load %arg3[%c5_76] : memref<8xf32, #tpu.memory_space<smem>>
    %123 = vector.broadcast %122 : f32 to vector<66x66xf32>
    %124 = arith.addf %121, %123 : vector<66x66xf32>
    %cst_77 = arith.constant 0.000000e+00 : f32
    %125 = vector.broadcast %cst_77 : f32 to vector<66x66xf32>
    %126 = arith.maximumf %124, %125 : vector<66x66xf32>
    %cst_78 = arith.constant 2.340000e-01 : f32
    %127 = vector.broadcast %cst_78 : f32 to vector<66x66xf32>
    %128 = arith.subf %126, %127 : vector<66x66xf32>
    %c0_79 = arith.constant 0 : index
    %c5_80 = arith.constant 5 : index
    %c0_81 = arith.constant 0 : index
    %c0_82 = arith.constant 0 : index
    %129 = vector.load %arg5[%c0_79, %c5_80, %c0_81, %c0_82] : memref<1x8x66x66xf32, #tpu.memory_space<vmem>>, vector<1x1x66x66xf32>
    %130 = vector.shape_cast %129 : vector<1x1x66x66xf32> to vector<66x66xf32>
    %131 = vector.shape_cast %128 : vector<66x66xf32> to vector<1x1x66x66xf32>
    tpu.vector_store %arg5[%c0_79, %c5_80, %c0_81, %c0_82], %131 {strides = array<i32>} : memref<1x8x66x66xf32, #tpu.memory_space<vmem>>, vector<1x1x66x66xf32>,
    %c6 = arith.constant 6 : index
    %c0_83 = arith.constant 0 : index
    %132 = memref.load %arg2[%c6, %c0_83] : memref<8x3xf32, #tpu.memory_space<smem>>
    %133 = vector.broadcast %132 : f32 to vector<66x66xf32>
    %134 = arith.mulf %1, %133 : vector<66x66xf32>
    %c6_84 = arith.constant 6 : index
    %c1_85 = arith.constant 1 : index
    %135 = memref.load %arg2[%c6_84, %c1_85] : memref<8x3xf32, #tpu.memory_space<smem>>
    %136 = vector.broadcast %135 : f32 to vector<66x66xf32>
    %137 = arith.mulf %3, %136 : vector<66x66xf32>
    %138 = arith.addf %134, %137 : vector<66x66xf32>
    %c6_86 = arith.constant 6 : index
    %c2_87 = arith.constant 2 : index
    %139 = memref.load %arg2[%c6_86, %c2_87] : memref<8x3xf32, #tpu.memory_space<smem>>
    %140 = vector.broadcast %139 : f32 to vector<66x66xf32>
    %141 = arith.mulf %5, %140 : vector<66x66xf32>
    %142 = arith.addf %138, %141 : vector<66x66xf32>
    %c6_88 = arith.constant 6 : index
    %143 = memref.load %arg3[%c6_88] : memref<8xf32, #tpu.memory_space<smem>>
    %144 = vector.broadcast %143 : f32 to vector<66x66xf32>
    %145 = arith.addf %142, %144 : vector<66x66xf32>
    %cst_89 = arith.constant 0.000000e+00 : f32
    %146 = vector.broadcast %cst_89 : f32 to vector<66x66xf32>
    %147 = arith.maximumf %145, %146 : vector<66x66xf32>
    %cst_90 = arith.constant 2.340000e-01 : f32
    %148 = vector.broadcast %cst_90 : f32 to vector<66x66xf32>
    %149 = arith.subf %147, %148 : vector<66x66xf32>
    %c0_91 = arith.constant 0 : index
    %c6_92 = arith.constant 6 : index
    %c0_93 = arith.constant 0 : index
    %c0_94 = arith.constant 0 : index
    %150 = vector.load %arg5[%c0_91, %c6_92, %c0_93, %c0_94] : memref<1x8x66x66xf32, #tpu.memory_space<vmem>>, vector<1x1x66x66xf32>
    %151 = vector.shape_cast %150 : vector<1x1x66x66xf32> to vector<66x66xf32>
    %152 = vector.shape_cast %149 : vector<66x66xf32> to vector<1x1x66x66xf32>
    tpu.vector_store %arg5[%c0_91, %c6_92, %c0_93, %c0_94], %152 {strides = array<i32>} : memref<1x8x66x66xf32, #tpu.memory_space<vmem>>, vector<1x1x66x66xf32>,
    %c7 = arith.constant 7 : index
    %c0_95 = arith.constant 0 : index
    %153 = memref.load %arg2[%c7, %c0_95] : memref<8x3xf32, #tpu.memory_space<smem>>
    %154 = vector.broadcast %153 : f32 to vector<66x66xf32>
    %155 = arith.mulf %1, %154 : vector<66x66xf32>
    %c7_96 = arith.constant 7 : index
    %c1_97 = arith.constant 1 : index
    %156 = memref.load %arg2[%c7_96, %c1_97] : memref<8x3xf32, #tpu.memory_space<smem>>
    %157 = vector.broadcast %156 : f32 to vector<66x66xf32>
    %158 = arith.mulf %3, %157 : vector<66x66xf32>
    %159 = arith.addf %155, %158 : vector<66x66xf32>
    %c7_98 = arith.constant 7 : index
    %c2_99 = arith.constant 2 : index
    %160 = memref.load %arg2[%c7_98, %c2_99] : memref<8x3xf32, #tpu.memory_space<smem>>
    %161 = vector.broadcast %160 : f32 to vector<66x66xf32>
    %162 = arith.mulf %5, %161 : vector<66x66xf32>
    %163 = arith.addf %159, %162 : vector<66x66xf32>
    %c7_100 = arith.constant 7 : index
    %164 = memref.load %arg3[%c7_100] : memref<8xf32, #tpu.memory_space<smem>>
    %165 = vector.broadcast %164 : f32 to vector<66x66xf32>
    %166 = arith.addf %163, %165 : vector<66x66xf32>
    %cst_101 = arith.constant 0.000000e+00 : f32
    %167 = vector.broadcast %cst_101 : f32 to vector<66x66xf32>
    %168 = arith.maximumf %166, %167 : vector<66x66xf32>
    %cst_102 = arith.constant 2.340000e-01 : f32
    %169 = vector.broadcast %cst_102 : f32 to vector<66x66xf32>
    %170 = arith.subf %168, %169 : vector<66x66xf32>
    %c0_103 = arith.constant 0 : index
    %c7_104 = arith.constant 7 : index
    %c0_105 = arith.constant 0 : index
    %c0_106 = arith.constant 0 : index
    %171 = vector.load %arg5[%c0_103, %c7_104, %c0_105, %c0_106] : memref<1x8x66x66xf32, #tpu.memory_space<vmem>>, vector<1x1x66x66xf32>
    %172 = vector.shape_cast %171 : vector<1x1x66x66xf32> to vector<66x66xf32>
    %173 = vector.shape_cast %170 : vector<66x66xf32> to vector<1x1x66x66xf32>
    tpu.vector_store %arg5[%c0_103, %c7_104, %c0_105, %c0_106], %173 {strides = array<i32>} : memref<1x8x66x66xf32, #tpu.memory_space<vmem>>, vector<1x1x66x66xf32>,
    return
  }
  func.func @transform_0(%arg0: i32, %arg1: i32) -> (i32, i32) {
    %c0_i32 = arith.constant 0 : i32
    %c0_i32_0 = arith.constant 0 : i32
    %c0_i32_1 = arith.constant 0 : i32
    return %c0_i32, %c0_i32_0 : i32, i32
  }
  func.func @transform_1(%arg0: i32, %arg1: i32) -> i32 {
    %c0_i32 = arith.constant 0 : i32
    %c0_i32_0 = arith.constant 0 : i32
    return %c0_i32 : i32
  }
  func.func @transform_2(%arg0: i32, %arg1: i32) -> (i32, i32, i32, i32) {
    %c0_i32 = arith.constant 0 : i32
    %c0_i32_0 = arith.constant 0 : i32
    %c0_i32_1 = arith.constant 0 : i32
    return %arg0, %c0_i32, %arg1, %c0_i32_0 : i32, i32, i32, i32
  }
  func.func @transform_3(%arg0: i32, %arg1: i32) -> (i32, i32, i32, i32) {
    %c0_i32 = arith.constant 0 : i32
    %c0_i32_0 = arith.constant 0 : i32
    %c0_i32_1 = arith.constant 0 : i32
    return %arg0, %c0_i32, %arg1, %c0_i32_0 : i32, i32, i32, i32
  }
}

</mosaic_0001>

<bundles_post_ra>
// kernel: conv1x1_relu_sub.1
= control target key start
LH: loop header
LB: loop body
LE: loop exit
PB: predicated region body
PF: predicated region fallthrough
CT: control target
= control target key end

     0   :  { %8 = vsyncpa [#allocation3], 0  ;;  %s2492_s0 = inlined_call_operand.vmem [shape: f32[8,3], index: 0, kind: input, shape index: {}]   ;;  %s2493_s1 = inlined_call_operand.vmem [shape: f32[8], index: 1, kind: input, shape index: {}]   ;;  %s2494_s2 = inlined_call_operand.vmem [shape: f32[2,3,66,66], index: 2, kind: input, shape index: {}]   ;;  %s2495_s3 = inlined_call_operand.vmem [shape: f32[2,8,66,66], index: 3, kind: output, shape index: {}]  }
   0x1   :  { %9 = vsyncpa [#allocation5], 0  ;;  %s1450_s12 = smov 0   ;;  %s1452_s13 = smov 0  }
   0x2   :  { %s1454_s14 = smov 0  }
   0x3 LB: > { %s1096_s15 = sadd.s32 4294967295, %s1426_s14   ;;  %s27_s16 = sadd.s32 1, %s1422_s13  ;;  %s1426_s14 = sphi %s1454_s14, %s15_s14   ;;  %s1422_s13 = sphi %s1452_s13, %s2505_s13   ;;  %s1418_s12 = sphi %s1450_s12, %s2504_s12  }
   0x4   : > { %p29_p0 = scmp.ge.s32.totalorder %s27_s16, 2  ;;  %p1098_p1 = scmp.ge.s32.totalorder %s1426_s14, 1 }
   0x5   : > { %p130_p2 = scmp.lt.s32.totalorder %s1426_s14, 3  ;;  %p1475_p4 = scmp.eq.s32.totalorder %s1096_s15, 0 }
   0x6   : > { %s2507_s16 = smov (%p29_p0, %s27_s16), 0  ;;  %s143_s21 = sshll.u32 %s2492_s0, 4  ;;  %s144_s21 = int_to_ptr.vmem [resolvable:$true] %s143_s21 }
   0x7   : > { %p1471_p3 = pnand %p1098_p1, %p130_p2  ;;  %s154_s24 = sshll.u32 %s2493_s1, 4  ;;  %s155_s24 = int_to_ptr.vmem [resolvable:$true] %s154_s24 }
   0x8   : > { %s2500_s18 = scalar_select %p1475_p4, 1, 0 }
   0x9   : > { %s2499_s17 = scalar_select %p1471_p3, 1, 0 }
   0xa   : > { %p1302_p5 = pneg %p1471_p3  ;;  %s1366_s26 = scalar_lea.vmem %s144_s21, 128 }
   0xb   : > { %p1367_p7 = scmp.ne.s32.totalorder %s144_s21, %s1366_s26  ;;  %p1374_p11 = scmp.lt.s32.totalorder %s144_s21, %s144_s21 }
   0xc   : > { %p1489_p6 = pnand %p1475_p4, %p1302_p5  ;;  %p1375_p12 = scmp.lt.s32.totalorder %s1366_s26, %s1366_s26 }
   0xe   : > { %p1368_p8 = pneg %p1489_p6  ;;  %p1376_p13 = por %p1375_p12, %p1374_p11 }
  0x10   : > { %p1369_p9 = pnand %p1368_p8, %p1367_p7 }
  0x12   : > { %p1370_p10 = pneg %p1369_p9 }
  0x14   : > { %p1377_p0 = pnand %p1376_p13, %p1370_p10 }
  0x16   : > { %1380 = shalt.err (!%p1377_p0)
}
  0x17   : > { %s1428_s27 = smov [#allocation2]   ;;  %s1381_s28 = scalar_lea.vmem %s155_s24, 16 }
  0x18   : > { %1305 = dma.vmem_to_smem (!%p1489_p6), %s144_s21, 128, %s1428_s27, [#allocation3]  }
  0x19   : > { %p1382_p1 = scmp.ne.s32.totalorder %s155_s24, %s1381_s28  ;;  %p1389_p4 = scmp.lt.s32.totalorder %s155_s24, %s155_s24 }
  0x1a   : > { %p1390_p3 = scmp.lt.s32.totalorder %s1381_s28, %s1381_s28 }
  0x1b   : > { %p1384_p2 = pnand %p1382_p1, %p1368_p8 }
  0x1c   : > { %p1391_p7 = por %p1390_p3, %p1389_p4 }
  0x1d   : > { %p1385_p5 = pneg %p1384_p2 }
  0x1f   : > { %p1392_p9 = pnand %p1391_p7, %p1385_p5 }
  0x21   : > { %1395 = shalt.err (!%p1392_p9)
}
  0x22   : > { %s1429_s29 = smov [#allocation4]   ;;  %p2502_p10 = scmp.ne.s32.totalorder %s2499_s17, 0 }
  0x23   : > { %1308 = dma.vmem_to_smem (!%p1489_p6), %s155_s24, 16, %s1429_s29, [#allocation5]  }
  0x24   : > { %180 = sbr.rel (%p2502_p10) target bundleno = 213 (0xd5), region = 32  ;;  %p2503_p11 = scmp.ne.s32.totalorder (!%p2502_p10), %s2500_s18, 0 }
  0x29   : > { %1409 = dma.done.wait (%p2503_p11), [#allocation3], 128  }
  0x2a   : > { %1411 = vsyncadd (%p2503_p11), [#allocation3], 4294967168 }
  0x2b   : > { %1413 = dma.done.wait (%p2503_p11), [#allocation5], 16  }
  0x2c   : > { %1415 = vsyncadd (%p2503_p11), [#allocation5], 4294967280 }
  0x2d   : > { %190 = sfence }
  0x2e   : > { %p218_p3 = scmp.lt.s32.totalorder %s1418_s12, 1  ;;  %s266_s30 = sld [smem:[#allocation2]]  ;;  %vm346_vm0 = vcmask 539648   ;;  %vm355_vm1 = vcmask 533504  }
  0x2f   : > { %s1125_s4 = sld [smem:[#allocation2 + $0x1]] }
  0x30   : > { %s2509_s12 = smov (!%p218_p3, %s1418_s12), 1  ;;  %s1126_s5 = sld [smem:[#allocation2 + $0x2]] }
  0x31   : > { %s1292_s6 = smul.u32 216, %s2509_s12  ;;  %s317_s7 = sld [smem:[#allocation4]] }
  0x32   : > { %s1293_s11 = smul.u32 576, %s2509_s12  ;;  %s1627_s12 = sld [smem:[#allocation2 + $0x80]] }
  0x33   : > { %s1517_s10 = scalar_lea.vmem %s2494_s2, %s1292_s6  ;;  %s1633_s15 = sld [smem:[#allocation2 + $0x81]] }
  0x34   : > { %v1519_v0 = vstv %s266_s30  ;;  %v1522_v1 = vld [vmem:[%s1517_s10] sm:$0xff]  ;;  %v1525_v2 = vld [vmem:[%s1517_s10 + $0x48] sm:$0xff]  ;;  %v1528_v3 = vld [vmem:[%s1517_s10 + $0x90] sm:$0xff]  ;;  %s1638_s19 = scalar_lea.vmem %s2495_s3, %s1293_s11  ;;  %s1647_s20 = sld [smem:[#allocation2 + $0x82]] }
  0x35   : > { %v1530_v4 = vstv %s1125_s4  ;;  %v268_v5 = vmul.f32 %v1519_v0, %v1522_v1  ;;  %v1537_v7 = vld [vmem:[%s1517_s10 + $0x8] sm:$0xff]  ;;  %v1540_v8 = vld [vmem:[%s1517_s10 + $0x50] sm:$0xff]  ;;  %v1543_v9 = vld [vmem:[%s1517_s10 + $0x98] sm:$0xff]  ;;  %s1657_s21 = sld [smem:[#allocation4 + $0x1]] }
  0x36   : > { %v279_v6 = vmul.f32 %v1525_v2, %v1530_v4  ;;  %v1545_v10 = vstv %s1126_s5  ;;  %v269_v11 = vmul.f32 %v1519_v0, %v1537_v7  ;;  %v280_v12 = vmul.f32 %v1540_v8, %v1530_v4  ;;  %v1552_v13 = vld [vmem:[%s1517_s10 + $0x10] sm:$0xff]  ;;  %v1555_v14 = vld [vmem:[%s1517_s10 + $0x58] sm:$0xff]  ;;  %v1558_v15 = vld [vmem:[%s1517_s10 + $0xa0] sm:$0xff]  ;;  %s1742_s22 = sld [smem:[#allocation2 + $0x100]] }
  0x37   : > { %v299_v17 = vmul.f32 %v1528_v3, %v1545_v10  ;;  %v1562_v18 = vstv %s317_s7  ;;  %v300_v19 = vmul.f32 %v1543_v9, %v1545_v10  ;;  %v1567_v20 = vld [vmem:[%s1517_s10 + $0x18] sm:$0xff]  ;;  %v1570_v21 = vld [vmem:[%s1517_s10 + $0x60] sm:$0xff]  ;;  %v1573_v22 = vld [vmem:[%s1517_s10 + $0xa8] sm:$0xff]  ;;  %v270_v24 = vmul.f32 %v1519_v0, %v1552_v13  ;;  %s1749_s23 = sld [smem:[#allocation2 + $0x101]] }
  0x38   : > { %v288_v16 = vadd.f32 %v279_v6, %v268_v5  ;;  %v289_v23 = vadd.f32 %v280_v12, %v269_v11  ;;  %v281_v25 = vmul.f32 %v1555_v14, %v1530_v4  ;;  %v301_v26 = vmul.f32 %v1558_v15, %v1545_v10  ;;  %v1582_v27 = vld [vmem:[%s1517_s10 + $0x20] sm:$0xff]  ;;  %v1585_v28 = vld [vmem:[%s1517_s10 + $0x68] sm:$0xff]  ;;  %v1588_v29 = vld [vmem:[%s1517_s10 + $0xb0] sm:$0xff]  ;;  %s1756_s24 = sld [smem:[#allocation2 + $0x102]] }
  0x39   : > { %v271_v31 = vmul.f32 %v1519_v0, %v1567_v20  ;;  %v282_v32 = vmul.f32 %v1570_v21, %v1530_v4  ;;  %v302_v33 = vmul.f32 %v1573_v22, %v1545_v10  ;;  %v1597_v34 = vld [vmem:[%s1517_s10 + $0x28] sm:$0xff]  ;;  %v1600_v35 = vld [vmem:[%s1517_s10 + $0x70] sm:$0xff]  ;;  %v272_v38 = vmul.f32 %v1519_v0, %v1582_v27  ;;  %v1608_v40 = vld [vmem:[%s1517_s10 + $0xb8] sm:$0xff]  ;;  %s1762_s25 = sld [smem:[#allocation4 + $0x2]] }
  0x3a   : > { %v308_v30 = vadd.f32 %v299_v17, %v288_v16  ;;  %v309_v36 = vadd.f32 %v300_v19, %v289_v23  ;;  %v290_v37 = vadd.f32 %v281_v25, %v270_v24  ;;  %v283_v39 = vmul.f32 %v1585_v28, %v1530_v4  ;;  %v1611_v41 = vld [vmem:[%s1517_s10 + $0x30] sm:$0xff]  ;;  %v1622_v50 = vld [vmem:[%s1517_s10 + $0x78] sm:$0xff]  ;;  %v1625_v51 = vld [vmem:[%s1517_s10 + $0xc0] sm:$0xff]  ;;  %s1852_s26 = sld [smem:[#allocation2 + $0x180]] }
  0x3b   : > { %v291_v43 = vadd.f32 %v282_v32, %v271_v31  ;;  %v303_v44 = vmul.f32 %v1588_v29, %v1545_v10  ;;  %v273_v45 = vmul.f32 %v1519_v0, %v1597_v34  ;;  %v284_v49 = vmul.f32 %v1600_v35, %v1530_v4  ;;  %v1642_v60 = vld [vmem:[%s1517_s10 + $0x38] sm:$0xff]  ;;  %v1645_v61 = vld [vmem:[%s1517_s10 + $0x80] sm:$0xff]  ;;  %v1655_v11 = vld [vmem:[%s1517_s10 + $0xc8] sm:$0xff]  ;;  %s1855_s27 = sld [smem:[#allocation2 + $0x181]] }
  0x3c   : > { %v319_v42 = vadd.f32 %v1562_v18, %v308_v30  ;;  %v320_v46 = vadd.f32 %v1562_v18, %v309_v36  ;;  %v310_v47 = vadd.f32 %v301_v26, %v290_v37  ;;  %v292_v48 = vadd.f32 %v283_v39, %v272_v38  ;;  %v1661_v23 = vld [vmem:[%s1517_s10 + $0x40] sm:$0x3]  ;;  %v1670_v31 = vld [vmem:[%s1517_s10 + $0x88] sm:$0x3]  ;;  %v1673_v32 = vld [vmem:[%s1517_s10 + $0xd0] sm:$0x3] }
  0x3d   : > { %v311_v53 = vadd.f32 %v302_v33, %v291_v43  ;;  %v304_v54 = vmul.f32 %v1608_v40, %v1545_v10  ;;  %v274_v55 = vmul.f32 %v1519_v0, %v1611_v41  ;;  %v293_v59 = vadd.f32 %v284_v49, %v273_v45  ;;  %s1861_s28 = sld [smem:[#allocation2 + $0x182]] }
  0x3e   : > { %v328_v52 = vmax.f32 %v319_v42, 0.0  ;;  %v329_v56 = vmax.f32 %v320_v46, 0.0  ;;  %v321_v57 = vadd.f32 %v1562_v18, %v310_v47  ;;  %v312_v58 = vadd.f32 %v303_v44, %v292_v48  ;;  %s1872_s29 = sld [smem:[#allocation4 + $0x3]] }
  0x3f   : > { %v322_v63 = vadd.f32 %v1562_v18, %v311_v53  ;;  %v285_v5 = vmul.f32 %v1622_v50, %v1530_v4  ;;  %v305_v6 = vmul.f32 %v1625_v51, %v1545_v10  ;;  %v313_v19 = vadd.f32 %v304_v54, %v293_v59  ;;  %s1953_s30 = sld [smem:[#allocation2 + $0x200]] }
  0x40   : > { %v1127_v62 = vadd.f32 -0.234, %v328_v52  ;;  %v1128_v12 = vadd.f32 -0.234, %v329_v56  ;;  %v330_v16 = vmax.f32 %v321_v57, 0.0  ;;  %v323_v17 = vadd.f32 %v1562_v18, %v312_v58  ;;  %s1956_s4 = sld [smem:[#allocation2 + $0x201]] }
  0x41   : > { %v331_v24 = vmax.f32 %v322_v63, 0.0  ;;  %v294_v25 = vadd.f32 %v285_v5, %v274_v55  ;;  %v275_v26 = vmul.f32 %v1519_v0, %v1642_v60  ;;  %v286_v30 = vmul.f32 %v1645_v61, %v1530_v4  ;;  %s1962_s5 = sld [smem:[#allocation2 + $0x202]] }
  0x42   : > { %347 = vst.msk [vmem:[%s1638_s19] sm:$0xff] %vm346_vm0, %v1127_v62  ;;  %348 = vst.msk [vmem:[%s1638_s19 + $0x8] sm:$0xff] %vm346_vm0, %v1128_v12  ;;  %v1129_v33 = vadd.f32 -0.234, %v330_v16  ;;  %v332_v36 = vmax.f32 %v323_v17, 0.0  ;;  %v324_v37 = vadd.f32 %v1562_v18, %v313_v19  ;;  %v306_v38 = vmul.f32 %v1655_v11, %v1545_v10  ;;  %s1973_s6 = sld [smem:[#allocation4 + $0x4]] }
  0x43   : > { %v1130_v39 = vadd.f32 -0.234, %v331_v24  ;;  %v314_v42 = vadd.f32 %v305_v6, %v294_v25  ;;  %v295_v43 = vadd.f32 %v286_v30, %v275_v26  ;;  %v276_v44 = vmul.f32 %v1519_v0, %v1661_v23  ;;  %s2054_s7 = sld [smem:[#allocation2 + $0x280]] }
  0x44   : > { %349 = vst.msk [vmem:[%s1638_s19 + $0x10] sm:$0xff] %vm346_vm0, %v1129_v33  ;;  %v1131_v45 = vadd.f32 -0.234, %v332_v36  ;;  %v333_v46 = vmax.f32 %v324_v37, 0.0  ;;  %v287_v47 = vmul.f32 %v1670_v31, %v1530_v4  ;;  %v307_v48 = vmul.f32 %v1673_v32, %v1545_v10  ;;  %s2057_s8 = sld [smem:[#allocation2 + $0x281]] }
  0x45   : > { %350 = vst.msk [vmem:[%s1638_s19 + $0x18] sm:$0xff] %vm346_vm0, %v1130_v39  ;;  %v325_v49 = vadd.f32 %v1562_v18, %v314_v42  ;;  %v315_v52 = vadd.f32 %v306_v38, %v295_v43  ;;  %v1692_v0 = vstv %s1627_s12  ;;  %v1695_v53 = vstv %s1633_s15  ;;  %s2063_s9 = sld [smem:[#allocation2 + $0x282]] }
  0x46   : > { %351 = vst.msk [vmem:[%s1638_s19 + $0x20] sm:$0xff] %vm346_vm0, %v1131_v45  ;;  %v1132_v54 = vadd.f32 -0.234, %v333_v46  ;;  %v296_v55 = vadd.f32 %v287_v47, %v276_v44  ;;  %v359_v4 = vmul.f32 %v1692_v0, %v1522_v1  ;;  %v370_v10 = vmul.f32 %v1525_v2, %v1695_v53  ;;  %s2074_s11 = sld [smem:[#allocation4 + $0x5]] }
  0x47   : > { %v334_v56 = vmax.f32 %v325_v49, 0.0  ;;  %v326_v57 = vadd.f32 %v1562_v18, %v315_v52  ;;  %v1705_v58 = vstv %s1647_s20  ;;  %v1708_v59 = vstv %s1657_s21  ;;  %s2155_s12 = sld [smem:[#allocation2 + $0x300]] }
  0x48   : > { %352 = vst.msk [vmem:[%s1638_s19 + $0x28] sm:$0xff] %vm346_vm0, %v1132_v54  ;;  %v316_v62 = vadd.f32 %v307_v48, %v296_v55  ;;  %v379_v63 = vadd.f32 %v370_v10, %v359_v4  ;;  %v390_v5 = vmul.f32 %v1528_v3, %v1705_v58  ;;  %v360_v6 = vmul.f32 %v1692_v0, %v1537_v7  ;;  %s2158_s15 = sld [smem:[#allocation2 + $0x301]] }
  0x49   : > { %v1133_v12 = vadd.f32 -0.234, %v334_v56  ;;  %v335_v16 = vmax.f32 %v326_v57, 0.0  ;;  %v371_v17 = vmul.f32 %v1540_v8, %v1695_v53  ;;  %v391_v19 = vmul.f32 %v1543_v9, %v1705_v58  ;;  %s2164_s17 = sld [smem:[#allocation2 + $0x302]] }
  0x4a   : > { %v327_v24 = vadd.f32 %v1562_v18, %v316_v62  ;;  %v399_v25 = vadd.f32 %v390_v5, %v379_v63  ;;  %v361_v26 = vmul.f32 %v1692_v0, %v1552_v13  ;;  %v372_v30 = vmul.f32 %v1555_v14, %v1695_v53  ;;  %s2175_s18 = sld [smem:[#allocation4 + $0x6]] }
  0x4b   : > { %353 = vst.msk [vmem:[%s1638_s19 + $0x30] sm:$0xff] %vm346_vm0, %v1133_v12  ;;  %v1134_v33 = vadd.f32 -0.234, %v335_v16  ;;  %v380_v36 = vadd.f32 %v371_v17, %v360_v6  ;;  %v392_v37 = vmul.f32 %v1558_v15, %v1705_v58  ;;  %v362_v38 = vmul.f32 %v1692_v0, %v1567_v20  ;;  %s2307_s20 = sld [smem:[#allocation2 + $0x380]] }
  0x4c   : > { %v336_v39 = vmax.f32 %v327_v24, 0.0  ;;  %v410_v18 = vadd.f32 %v1708_v59, %v399_v25  ;;  %v381_v42 = vadd.f32 %v372_v30, %v361_v26  ;;  %v373_v43 = vmul.f32 %v1570_v21, %v1695_v53  ;;  %s2310_s21 = sld [smem:[#allocation2 + $0x381]] }
  0x4d   : > { %354 = vst.msk [vmem:[%s1638_s19 + $0x38] sm:$0xff] %vm346_vm0, %v1134_v33  ;;  %v400_v44 = vadd.f32 %v391_v19, %v380_v36  ;;  %v393_v45 = vmul.f32 %v1573_v22, %v1705_v58  ;;  %v363_v46 = vmul.f32 %v1692_v0, %v1582_v27  ;;  %v374_v47 = vmul.f32 %v1585_v28, %v1695_v53 }
  0x4e   : > { %v1135_v48 = vadd.f32 -0.234, %v336_v39  ;;  %v419_v49 = vmax.f32 %v410_v18, 0.0  ;;  %v401_v52 = vadd.f32 %v392_v37, %v381_v42  ;;  %v382_v54 = vadd.f32 %v373_v43, %v362_v38 }
  0x4f   : > { %v411_v55 = vadd.f32 %v1708_v59, %v400_v44  ;;  %v383_v4 = vadd.f32 %v374_v47, %v363_v46  ;;  %v394_v10 = vmul.f32 %v1588_v29, %v1705_v58  ;;  %v364_v56 = vmul.f32 %v1692_v0, %v1597_v34 }
  0x50   : > { %356 = vst.msk [vmem:[%s1638_s19 + $0x40] sm:$0x3] %vm355_vm1, %v1135_v48  ;;  %v1140_v57 = vadd.f32 -0.234, %v419_v49  ;;  %v412_v62 = vadd.f32 %v1708_v59, %v401_v52  ;;  %v402_v63 = vadd.f32 %v393_v45, %v382_v54  ;;  %v375_v5 = vmul.f32 %v1600_v35, %v1695_v53 }
  0x51   : > { %v420_v6 = vmax.f32 %v411_v55, 0.0  ;;  %v403_v12 = vadd.f32 %v394_v10, %v383_v4  ;;  %v395_v16 = vmul.f32 %v1608_v40, %v1705_v58  ;;  %v365_v17 = vmul.f32 %v1692_v0, %v1611_v41 }
  0x52   : > { %1149 = vst.msk [vmem:[%s1638_s19 + $0x48] sm:$0xff] %vm346_vm0, %v1140_v57  ;;  %v421_v19 = vmax.f32 %v412_v62, 0.0  ;;  %v413_v24 = vadd.f32 %v1708_v59, %v402_v63  ;;  %v384_v25 = vadd.f32 %v375_v5, %v364_v56  ;;  %v376_v26 = vmul.f32 %v1622_v50, %v1695_v53 }
  0x53   : > { %v1141_v30 = vadd.f32 -0.234, %v420_v6  ;;  %v414_v33 = vadd.f32 %v1708_v59, %v403_v12  ;;  %v396_v36 = vmul.f32 %v1625_v51, %v1705_v58  ;;  %v366_v37 = vmul.f32 %v1692_v0, %v1642_v60 }
  0x54   : > { %v1142_v38 = vadd.f32 -0.234, %v421_v19  ;;  %v422_v39 = vmax.f32 %v413_v24, 0.0  ;;  %v404_v18 = vadd.f32 %v395_v16, %v384_v25  ;;  %v385_v42 = vadd.f32 %v376_v26, %v365_v17 }
  0x55   : > { %1150 = vst.msk [vmem:[%s1638_s19 + $0x50] sm:$0xff] %vm346_vm0, %v1141_v30  ;;  %v423_v43 = vmax.f32 %v414_v33, 0.0  ;;  %v377_v44 = vmul.f32 %v1645_v61, %v1695_v53  ;;  %v397_v45 = vmul.f32 %v1655_v11, %v1705_v58  ;;  %v367_v46 = vmul.f32 %v1692_v0, %v1661_v23 }
  0x56   : > { %1151 = vst.msk [vmem:[%s1638_s19 + $0x58] sm:$0xff] %vm346_vm0, %v1142_v38  ;;  %v1143_v47 = vadd.f32 -0.234, %v422_v39  ;;  %v415_v48 = vadd.f32 %v1708_v59, %v404_v18  ;;  %v405_v49 = vadd.f32 %v396_v36, %v385_v42  ;;  %v378_v52 = vmul.f32 %v1670_v31, %v1695_v53 }
  0x57   : > { %v1144_v54 = vadd.f32 -0.234, %v423_v43  ;;  %v386_v55 = vadd.f32 %v377_v44, %v366_v37  ;;  %v398_v4 = vmul.f32 %v1673_v32, %v1705_v58  ;;  %v1790_v10 = vstv %s1742_s22  ;;  %s2322_s22 = sld [smem:[#allocation2 + $0x382]] }
  0x58   : > { %1152 = vst.msk [vmem:[%s1638_s19 + $0x60] sm:$0xff] %vm346_vm0, %v1143_v47  ;;  %v424_v0 = vmax.f32 %v415_v48, 0.0  ;;  %v416_v56 = vadd.f32 %v1708_v59, %v405_v49  ;;  %v387_v57 = vadd.f32 %v378_v52, %v367_v46  ;;  %v449_v62 = vmul.f32 %v1790_v10, %v1522_v1 }
  0x59   : > { %1153 = vst.msk [vmem:[%s1638_s19 + $0x68] sm:$0xff] %vm346_vm0, %v1144_v54  ;;  %v406_v53 = vadd.f32 %v397_v45, %v386_v55  ;;  %v1800_v63 = vstv %s1749_s23  ;;  %v1803_v5 = vstv %s1756_s24  ;;  %v1806_v58 = vstv %s1762_s25  ;;  %s2342_s23 = sld [smem:[#allocation4 + $0x7]] }
  0x5a   : > { %v1145_v6 = vadd.f32 -0.234, %v424_v0  ;;  %v425_v12 = vmax.f32 %v416_v56, 0.0  ;;  %v407_v16 = vadd.f32 %v398_v4, %v387_v57  ;;  %v460_v17 = vmul.f32 %v1525_v2, %v1800_v63 }
  0x5b   : > { %v417_v19 = vadd.f32 %v1708_v59, %v406_v53  ;;  %v480_v24 = vmul.f32 %v1528_v3, %v1803_v5  ;;  %v450_v25 = vmul.f32 %v1790_v10, %v1537_v7  ;;  %v461_v26 = vmul.f32 %v1540_v8, %v1800_v63 }
  0x5c   : > { %1154 = vst.msk [vmem:[%s1638_s19 + $0x70] sm:$0xff] %vm346_vm0, %v1145_v6  ;;  %v1146_v30 = vadd.f32 -0.234, %v425_v12  ;;  %v418_v33 = vadd.f32 %v1708_v59, %v407_v16  ;;  %v469_v36 = vadd.f32 %v460_v17, %v449_v62  ;;  %v481_v37 = vmul.f32 %v1543_v9, %v1803_v5 }
  0x5d   : > { %v426_v38 = vmax.f32 %v417_v19, 0.0  ;;  %v470_v39 = vadd.f32 %v461_v26, %v450_v25  ;;  %v451_v18 = vmul.f32 %v1790_v10, %v1552_v13  ;;  %v462_v42 = vmul.f32 %v1555_v14, %v1800_v63 }
  0x5e   : > { %1155 = vst.msk [vmem:[%s1638_s19 + $0x78] sm:$0xff] %vm346_vm0, %v1146_v30  ;;  %v427_v43 = vmax.f32 %v418_v33, 0.0  ;;  %v489_v44 = vadd.f32 %v480_v24, %v469_v36  ;;  %v482_v59 = vmul.f32 %v1558_v15, %v1803_v5  ;;  %v452_v45 = vmul.f32 %v1790_v10, %v1567_v20 }
  0x5f   : > { %v1147_v46 = vadd.f32 -0.234, %v426_v38  ;;  %v490_v47 = vadd.f32 %v481_v37, %v470_v39  ;;  %v471_v48 = vadd.f32 %v462_v42, %v451_v18  ;;  %v463_v49 = vmul.f32 %v1570_v21, %v1800_v63 }
  0x60   : > { %v1148_v52 = vadd.f32 -0.234, %v427_v43  ;;  %v500_v54 = vadd.f32 %v1806_v58, %v489_v44  ;;  %v483_v55 = vmul.f32 %v1573_v22, %v1803_v5  ;;  %v453_v4 = vmul.f32 %v1790_v10, %v1582_v27 }
  0x61   : > { %1156 = vst.msk [vmem:[%s1638_s19 + $0x80] sm:$0xff] %vm346_vm0, %v1147_v46  ;;  %v501_v0 = vadd.f32 %v1806_v58, %v490_v47  ;;  %v491_v56 = vadd.f32 %v482_v59, %v471_v48  ;;  %v472_v57 = vadd.f32 %v463_v49, %v452_v45  ;;  %v464_v62 = vmul.f32 %v1585_v28, %v1800_v63 }
  0x62   : > { %1157 = vst.msk [vmem:[%s1638_s19 + $0x88] sm:$0x3] %vm355_vm1, %v1148_v52  ;;  %v509_v53 = vmax.f32 %v500_v54, 0.0  ;;  %v484_v6 = vmul.f32 %v1588_v29, %v1803_v5  ;;  %v454_v12 = vmul.f32 %v1790_v10, %v1597_v34  ;;  %v465_v16 = vmul.f32 %v1600_v35, %v1800_v63 }
  0x63   : > { %v510_v17 = vmax.f32 %v501_v0, 0.0  ;;  %v502_v19 = vadd.f32 %v1806_v58, %v491_v56  ;;  %v492_v24 = vadd.f32 %v483_v55, %v472_v57  ;;  %v473_v25 = vadd.f32 %v464_v62, %v453_v4 }
  0x64   : > { %v1162_v26 = vadd.f32 -0.234, %v509_v53  ;;  %v474_v30 = vadd.f32 %v465_v16, %v454_v12  ;;  %v485_v33 = vmul.f32 %v1608_v40, %v1803_v5  ;;  %v455_v36 = vmul.f32 %v1790_v10, %v1611_v41 }
  0x65   : > { %v1163_v37 = vadd.f32 -0.234, %v510_v17  ;;  %v511_v38 = vmax.f32 %v502_v19, 0.0  ;;  %v503_v39 = vadd.f32 %v1806_v58, %v492_v24  ;;  %v493_v18 = vadd.f32 %v484_v6, %v473_v25 }
  0x66   : > { %1171 = vst.msk [vmem:[%s1638_s19 + $0x90] sm:$0xff] %vm346_vm0, %v1162_v26  ;;  %v494_v42 = vadd.f32 %v485_v33, %v474_v30  ;;  %v466_v43 = vmul.f32 %v1622_v50, %v1800_v63  ;;  %v486_v44 = vmul.f32 %v1625_v51, %v1803_v5  ;;  %v456_v59 = vmul.f32 %v1790_v10, %v1642_v60 }
  0x67   : > { %1172 = vst.msk [vmem:[%s1638_s19 + $0x98] sm:$0xff] %vm346_vm0, %v1163_v37  ;;  %v1164_v45 = vadd.f32 -0.234, %v511_v38  ;;  %v512_v46 = vmax.f32 %v503_v39, 0.0  ;;  %v504_v47 = vadd.f32 %v1806_v58, %v493_v18  ;;  %v467_v48 = vmul.f32 %v1645_v61, %v1800_v63 }
  0x68   : > { %v505_v49 = vadd.f32 %v1806_v58, %v494_v42  ;;  %v475_v52 = vadd.f32 %v466_v43, %v455_v36  ;;  %v487_v54 = vmul.f32 %v1655_v11, %v1803_v5  ;;  %v457_v55 = vmul.f32 %v1790_v10, %v1661_v23 }
  0x69   : > { %1173 = vst.msk [vmem:[%s1638_s19 + $0xa0] sm:$0xff] %vm346_vm0, %v1164_v45  ;;  %v1165_v4 = vadd.f32 -0.234, %v512_v46  ;;  %v513_v0 = vmax.f32 %v504_v47, 0.0  ;;  %v476_v56 = vadd.f32 %v467_v48, %v456_v59  ;;  %v468_v57 = vmul.f32 %v1670_v31, %v1800_v63 }
  0x6a   : > { %v514_v62 = vmax.f32 %v505_v49, 0.0  ;;  %v495_v53 = vadd.f32 %v486_v44, %v475_v52  ;;  %v488_v6 = vmul.f32 %v1673_v32, %v1803_v5  ;;  %v1891_v12 = vstv %s1852_s26 }
  0x6b   : > { %1174 = vst.msk [vmem:[%s1638_s19 + $0xa8] sm:$0xff] %vm346_vm0, %v1165_v4  ;;  %v1166_v10 = vadd.f32 -0.234, %v513_v0  ;;  %v496_v16 = vadd.f32 %v487_v54, %v476_v56  ;;  %v477_v17 = vadd.f32 %v468_v57, %v457_v55  ;;  %v539_v19 = vmul.f32 %v1891_v12, %v1522_v1 }
  0x6c   : > { %v1167_v24 = vadd.f32 -0.234, %v514_v62  ;;  %v506_v63 = vadd.f32 %v1806_v58, %v495_v53  ;;  %v1899_v25 = vstv %s1855_s27  ;;  %v1902_v26 = vstv %s1861_s28 }
  0x6d   : > { %1175 = vst.msk [vmem:[%s1638_s19 + $0xb0] sm:$0xff] %vm346_vm0, %v1166_v10  ;;  %v507_v5 = vadd.f32 %v1806_v58, %v496_v16  ;;  %v497_v30 = vadd.f32 %v488_v6, %v477_v17  ;;  %v550_v33 = vmul.f32 %v1525_v2, %v1899_v25  ;;  %v570_v36 = vmul.f32 %v1528_v3, %v1902_v26 }
  0x6e   : > { %1176 = vst.msk [vmem:[%s1638_s19 + $0xb8] sm:$0xff] %vm346_vm0, %v1167_v24  ;;  %v515_v37 = vmax.f32 %v506_v63, 0.0  ;;  %v1914_v38 = vstv %s1872_s29  ;;  %v540_v39 = vmul.f32 %v1891_v12, %v1537_v7  ;;  %v551_v18 = vmul.f32 %v1540_v8, %v1899_v25 }
  0x6f   : > { %v516_v42 = vmax.f32 %v507_v5, 0.0  ;;  %v508_v43 = vadd.f32 %v1806_v58, %v497_v30  ;;  %v559_v44 = vadd.f32 %v550_v33, %v539_v19  ;;  %v571_v59 = vmul.f32 %v1543_v9, %v1902_v26 }
  0x70   : > { %v1168_v45 = vadd.f32 -0.234, %v515_v37  ;;  %v560_v46 = vadd.f32 %v551_v18, %v540_v39  ;;  %v541_v47 = vmul.f32 %v1891_v12, %v1552_v13  ;;  %v552_v48 = vmul.f32 %v1555_v14, %v1899_v25 }
  0x71   : > { %v1169_v49 = vadd.f32 -0.234, %v516_v42  ;;  %v517_v52 = vmax.f32 %v508_v43, 0.0  ;;  %v579_v54 = vadd.f32 %v570_v36, %v559_v44  ;;  %v572_v58 = vmul.f32 %v1558_v15, %v1902_v26 }
  0x72   : > { %1177 = vst.msk [vmem:[%s1638_s19 + $0xc0] sm:$0xff] %vm346_vm0, %v1168_v45  ;;  %v580_v55 = vadd.f32 %v571_v59, %v560_v46  ;;  %v561_v4 = vadd.f32 %v552_v48, %v541_v47  ;;  %v542_v0 = vmul.f32 %v1891_v12, %v1567_v20  ;;  %v553_v56 = vmul.f32 %v1570_v21, %v1899_v25 }
  0x73   : > { %1178 = vst.msk [vmem:[%s1638_s19 + $0xc8] sm:$0xff] %vm346_vm0, %v1169_v49  ;;  %v1170_v57 = vadd.f32 -0.234, %v517_v52  ;;  %v590_v62 = vadd.f32 %v1914_v38, %v579_v54  ;;  %v573_v53 = vmul.f32 %v1573_v22, %v1902_v26  ;;  %v543_v6 = vmul.f32 %v1891_v12, %v1582_v27 }
  0x74   : > { %v591_v10 = vadd.f32 %v1914_v38, %v580_v55  ;;  %v581_v16 = vadd.f32 %v572_v58, %v561_v4  ;;  %v562_v17 = vadd.f32 %v553_v56, %v542_v0  ;;  %v554_v19 = vmul.f32 %v1585_v28, %v1899_v25 }
  0x75   : > { %1179 = vst.msk [vmem:[%s1638_s19 + $0xd0] sm:$0x3] %vm355_vm1, %v1170_v57  ;;  %v599_v24 = vmax.f32 %v590_v62, 0.0  ;;  %v574_v63 = vmul.f32 %v1588_v29, %v1902_v26  ;;  %v544_v5 = vmul.f32 %v1891_v12, %v1597_v34  ;;  %v555_v30 = vmul.f32 %v1600_v35, %v1899_v25 }
  0x76   : > { %v600_v33 = vmax.f32 %v591_v10, 0.0  ;;  %v592_v36 = vadd.f32 %v1914_v38, %v581_v16  ;;  %v582_v37 = vadd.f32 %v573_v53, %v562_v17  ;;  %v563_v39 = vadd.f32 %v554_v19, %v543_v6 }
  0x77   : > { %v1184_v18 = vadd.f32 -0.234, %v599_v24  ;;  %v564_v42 = vadd.f32 %v555_v30, %v544_v5  ;;  %v575_v43 = vmul.f32 %v1608_v40, %v1902_v26  ;;  %v545_v44 = vmul.f32 %v1891_v12, %v1611_v41 }
  0x78   : > { %v1185_v59 = vadd.f32 -0.234, %v600_v33  ;;  %v601_v45 = vmax.f32 %v592_v36, 0.0  ;;  %v593_v46 = vadd.f32 %v1914_v38, %v582_v37  ;;  %v583_v47 = vadd.f32 %v574_v63, %v563_v39 }
  0x79   : > { %1193 = vst.msk [vmem:[%s1638_s19 + $0xd8] sm:$0xff] %vm346_vm0, %v1184_v18  ;;  %v584_v48 = vadd.f32 %v575_v43, %v564_v42  ;;  %v556_v49 = vmul.f32 %v1622_v50, %v1899_v25  ;;  %v576_v52 = vmul.f32 %v1625_v51, %v1902_v26  ;;  %v546_v54 = vmul.f32 %v1891_v12, %v1642_v60 }
  0x7a   : > { %1194 = vst.msk [vmem:[%s1638_s19 + $0xe0] sm:$0xff] %vm346_vm0, %v1185_v59  ;;  %v1186_v58 = vadd.f32 -0.234, %v601_v45  ;;  %v602_v55 = vmax.f32 %v593_v46, 0.0  ;;  %v594_v4 = vadd.f32 %v1914_v38, %v583_v47  ;;  %v557_v0 = vmul.f32 %v1645_v61, %v1899_v25 }
  0x7b   : > { %v595_v56 = vadd.f32 %v1914_v38, %v584_v48  ;;  %v565_v57 = vadd.f32 %v556_v49, %v545_v44  ;;  %v577_v62 = vmul.f32 %v1655_v11, %v1902_v26  ;;  %v547_v53 = vmul.f32 %v1891_v12, %v1661_v23 }
  0x7c   : > { %1195 = vst.msk [vmem:[%s1638_s19 + $0xe8] sm:$0xff] %vm346_vm0, %v1186_v58  ;;  %v1187_v6 = vadd.f32 -0.234, %v602_v55  ;;  %v603_v10 = vmax.f32 %v594_v4, 0.0  ;;  %v566_v16 = vadd.f32 %v557_v0, %v546_v54  ;;  %v558_v17 = vmul.f32 %v1670_v31, %v1899_v25 }
  0x7d   : > { %v604_v19 = vmax.f32 %v595_v56, 0.0  ;;  %v585_v24 = vadd.f32 %v576_v52, %v565_v57  ;;  %v578_v63 = vmul.f32 %v1673_v32, %v1902_v26  ;;  %v1992_v5 = vstv %s1953_s30 }
  0x7e   : > { %1196 = vst.msk [vmem:[%s1638_s19 + $0xf0] sm:$0xff] %vm346_vm0, %v1187_v6  ;;  %v1188_v12 = vadd.f32 -0.234, %v603_v10  ;;  %v586_v30 = vadd.f32 %v577_v62, %v566_v16  ;;  %v567_v33 = vadd.f32 %v558_v17, %v547_v53  ;;  %v629_v36 = vmul.f32 %v1992_v5, %v1522_v1 }
  0x7f   : > { %v1189_v37 = vadd.f32 -0.234, %v604_v19  ;;  %v596_v25 = vadd.f32 %v1914_v38, %v585_v24  ;;  %v2000_v39 = vstv %s1956_s4  ;;  %v2003_v18 = vstv %s1962_s5 }
  0x80   : > { %1197 = vst.msk [vmem:[%s1638_s19 + $0xf8] sm:$0xff] %vm346_vm0, %v1188_v12  ;;  %v597_v26 = vadd.f32 %v1914_v38, %v586_v30  ;;  %v587_v42 = vadd.f32 %v578_v63, %v567_v33  ;;  %v640_v43 = vmul.f32 %v1525_v2, %v2000_v39  ;;  %v660_v44 = vmul.f32 %v1528_v3, %v2003_v18 }
  0x81   : > { %1198 = vst.msk [vmem:[%s1638_s19 + $0x100] sm:$0xff] %vm346_vm0, %v1189_v37  ;;  %v605_v59 = vmax.f32 %v596_v25, 0.0  ;;  %v2015_v45 = vstv %s1973_s6  ;;  %v630_v46 = vmul.f32 %v1992_v5, %v1537_v7  ;;  %v641_v47 = vmul.f32 %v1540_v8, %v2000_v39 }
  0x82   : > { %v606_v48 = vmax.f32 %v597_v26, 0.0  ;;  %v598_v49 = vadd.f32 %v1914_v38, %v587_v42  ;;  %v649_v52 = vadd.f32 %v640_v43, %v629_v36  ;;  %v661_v54 = vmul.f32 %v1543_v9, %v2003_v18 }
  0x83   : > { %v1190_v58 = vadd.f32 -0.234, %v605_v59  ;;  %v650_v55 = vadd.f32 %v641_v47, %v630_v46  ;;  %v631_v4 = vmul.f32 %v1992_v5, %v1552_v13  ;;  %v642_v0 = vmul.f32 %v1555_v14, %v2000_v39 }
  0x84   : > { %v1191_v56 = vadd.f32 -0.234, %v606_v48  ;;  %v607_v57 = vmax.f32 %v598_v49, 0.0  ;;  %v669_v62 = vadd.f32 %v660_v44, %v649_v52  ;;  %v662_v38 = vmul.f32 %v1558_v15, %v2003_v18 }
  0x85   : > { %1199 = vst.msk [vmem:[%s1638_s19 + $0x108] sm:$0xff] %vm346_vm0, %v1190_v58  ;;  %v670_v53 = vadd.f32 %v661_v54, %v650_v55  ;;  %v651_v6 = vadd.f32 %v642_v0, %v631_v4  ;;  %v632_v10 = vmul.f32 %v1992_v5, %v1567_v20  ;;  %v643_v16 = vmul.f32 %v1570_v21, %v2000_v39 }
  0x86   : > { %1200 = vst.msk [vmem:[%s1638_s19 + $0x110] sm:$0xff] %vm346_vm0, %v1191_v56  ;;  %v1192_v17 = vadd.f32 -0.234, %v607_v57  ;;  %v680_v19 = vadd.f32 %v2015_v45, %v669_v62  ;;  %v663_v24 = vmul.f32 %v1573_v22, %v2003_v18  ;;  %v633_v63 = vmul.f32 %v1992_v5, %v1582_v27 }
  0x87   : > { %v681_v12 = vadd.f32 %v2015_v45, %v670_v53  ;;  %v671_v30 = vadd.f32 %v662_v38, %v651_v6  ;;  %v652_v33 = vadd.f32 %v643_v16, %v632_v10  ;;  %v644_v36 = vmul.f32 %v1585_v28, %v2000_v39 }
  0x88   : > { %1201 = vst.msk [vmem:[%s1638_s19 + $0x118] sm:$0x3] %vm355_vm1, %v1192_v17  ;;  %v689_v37 = vmax.f32 %v680_v19, 0.0  ;;  %v664_v25 = vmul.f32 %v1588_v29, %v2003_v18  ;;  %v634_v26 = vmul.f32 %v1992_v5, %v1597_v34  ;;  %v645_v42 = vmul.f32 %v1600_v35, %v2000_v39 }
  0x89   : > { %v690_v43 = vmax.f32 %v681_v12, 0.0  ;;  %v682_v44 = vadd.f32 %v2015_v45, %v671_v30  ;;  %v672_v59 = vadd.f32 %v663_v24, %v652_v33  ;;  %v653_v46 = vadd.f32 %v644_v36, %v633_v63 }
  0x8a   : > { %v1206_v47 = vadd.f32 -0.234, %v689_v37  ;;  %v654_v48 = vadd.f32 %v645_v42, %v634_v26  ;;  %v665_v49 = vmul.f32 %v1608_v40, %v2003_v18  ;;  %v635_v52 = vmul.f32 %v1992_v5, %v1611_v41 }
  0x8b   : > { %v1207_v54 = vadd.f32 -0.234, %v690_v43  ;;  %v691_v58 = vmax.f32 %v682_v44, 0.0  ;;  %v683_v55 = vadd.f32 %v2015_v45, %v672_v59  ;;  %v673_v4 = vadd.f32 %v664_v25, %v653_v46 }
  0x8c   : > { %1215 = vst.msk [vmem:[%s1638_s19 + $0x120] sm:$0xff] %vm346_vm0, %v1206_v47  ;;  %v674_v0 = vadd.f32 %v665_v49, %v654_v48  ;;  %v646_v56 = vmul.f32 %v1622_v50, %v2000_v39  ;;  %v666_v57 = vmul.f32 %v1625_v51, %v2003_v18  ;;  %v636_v62 = vmul.f32 %v1992_v5, %v1642_v60 }
  0x8d   : > { %1216 = vst.msk [vmem:[%s1638_s19 + $0x128] sm:$0xff] %vm346_vm0, %v1207_v54  ;;  %v1208_v38 = vadd.f32 -0.234, %v691_v58  ;;  %v692_v53 = vmax.f32 %v683_v55, 0.0  ;;  %v684_v6 = vadd.f32 %v2015_v45, %v673_v4  ;;  %v647_v10 = vmul.f32 %v1645_v61, %v2000_v39 }
  0x8e   : > { %v685_v16 = vadd.f32 %v2015_v45, %v674_v0  ;;  %v655_v17 = vadd.f32 %v646_v56, %v635_v52  ;;  %v667_v19 = vmul.f32 %v1655_v11, %v2003_v18  ;;  %v637_v24 = vmul.f32 %v1992_v5, %v1661_v23 }
  0x8f   : > { %1217 = vst.msk [vmem:[%s1638_s19 + $0x130] sm:$0xff] %vm346_vm0, %v1208_v38  ;;  %v1209_v63 = vadd.f32 -0.234, %v692_v53  ;;  %v693_v12 = vmax.f32 %v684_v6, 0.0  ;;  %v656_v30 = vadd.f32 %v647_v10, %v636_v62  ;;  %v648_v33 = vmul.f32 %v1670_v31, %v2000_v39 }
  0x90   : > { %v694_v36 = vmax.f32 %v685_v16, 0.0  ;;  %v675_v37 = vadd.f32 %v666_v57, %v655_v17  ;;  %v668_v25 = vmul.f32 %v1673_v32, %v2003_v18  ;;  %v2093_v26 = vstv %s2054_s7 }
  0x91   : > { %1218 = vst.msk [vmem:[%s1638_s19 + $0x138] sm:$0xff] %vm346_vm0, %v1209_v63  ;;  %v1210_v5 = vadd.f32 -0.234, %v693_v12  ;;  %v676_v42 = vadd.f32 %v667_v19, %v656_v30  ;;  %v657_v43 = vadd.f32 %v648_v33, %v637_v24  ;;  %v719_v44 = vmul.f32 %v2093_v26, %v1522_v1 }
  0x92   : > { %v1211_v59 = vadd.f32 -0.234, %v694_v36  ;;  %v686_v39 = vadd.f32 %v2015_v45, %v675_v37  ;;  %v2101_v46 = vstv %s2057_s8  ;;  %v2104_v47 = vstv %s2063_s9 }
  0x93   : > { %1219 = vst.msk [vmem:[%s1638_s19 + $0x140] sm:$0xff] %vm346_vm0, %v1210_v5  ;;  %v687_v18 = vadd.f32 %v2015_v45, %v676_v42  ;;  %v677_v48 = vadd.f32 %v668_v25, %v657_v43  ;;  %v730_v49 = vmul.f32 %v1525_v2, %v2101_v46  ;;  %v750_v52 = vmul.f32 %v1528_v3, %v2104_v47 }
  0x94   : > { %1220 = vst.msk [vmem:[%s1638_s19 + $0x148] sm:$0xff] %vm346_vm0, %v1211_v59  ;;  %v695_v1 = vmax.f32 %v686_v39, 0.0  ;;  %v2116_v54 = vstv %s2074_s11  ;;  %v720_v58 = vmul.f32 %v2093_v26, %v1537_v7  ;;  %v731_v55 = vmul.f32 %v1540_v8, %v2101_v46 }
  0x95   : > { %v696_v4 = vmax.f32 %v687_v18, 0.0  ;;  %v688_v0 = vadd.f32 %v2015_v45, %v677_v48  ;;  %v739_v2 = vadd.f32 %v730_v49, %v719_v44  ;;  %v751_v3 = vmul.f32 %v1543_v9, %v2104_v47 }
  0x96   : > { %v1212_v56 = vadd.f32 -0.234, %v695_v1  ;;  %v740_v57 = vadd.f32 %v731_v55, %v720_v58  ;;  %v721_v62 = vmul.f32 %v2093_v26, %v1552_v13  ;;  %v732_v38 = vmul.f32 %v1555_v14, %v2101_v46 }
  0x97   : > { %v1213_v7 = vadd.f32 -0.234, %v696_v4  ;;  %v697_v53 = vmax.f32 %v688_v0, 0.0  ;;  %v759_v6 = vadd.f32 %v750_v52, %v739_v2  ;;  %v752_v8 = vmul.f32 %v1558_v15, %v2104_v47 }
  0x98   : > { %1221 = vst.msk [vmem:[%s1638_s19 + $0x150] sm:$0xff] %vm346_vm0, %v1212_v56  ;;  %v760_v45 = vadd.f32 %v751_v3, %v740_v57  ;;  %v741_v10 = vadd.f32 %v732_v38, %v721_v62  ;;  %v722_v9 = vmul.f32 %v2093_v26, %v1567_v20  ;;  %v733_v13 = vmul.f32 %v1570_v21, %v2101_v46  ;;  %v2199_v56 = vld [vmem:[%s1517_s10] sm:$0xff] }
  0x99   : > { %1222 = vst.msk [vmem:[%s1638_s19 + $0x158] sm:$0xff] %vm346_vm0, %v1213_v7  ;;  %v1214_v14 = vadd.f32 -0.234, %v697_v53  ;;  %v770_v16 = vadd.f32 %v2116_v54, %v759_v6  ;;  %v753_v17 = vmul.f32 %v1573_v22, %v2104_v47  ;;  %v723_v15 = vmul.f32 %v2093_v26, %v1582_v27  ;;  %v2214_v7 = vld [vmem:[%s1517_s10 + $0x48] sm:$0xff]  ;;  %v2219_v6 = vld [vmem:[%s1517_s10 + $0x90] sm:$0xff] }
  0x9a   : > { %v771_v19 = vadd.f32 %v2116_v54, %v760_v45  ;;  %v761_v24 = vadd.f32 %v752_v8, %v741_v10  ;;  %v742_v63 = vadd.f32 %v733_v13, %v722_v9  ;;  %v734_v20 = vmul.f32 %v1585_v28, %v2101_v46  ;;  %v2229_v9 = vld [vmem:[%s1517_s10 + $0x8] sm:$0xff] }
  0x9b   : > { %1223 = vst.msk [vmem:[%s1638_s19 + $0x160] sm:$0x3] %vm355_vm1, %v1214_v14  ;;  %v779_v21 = vmax.f32 %v770_v16, 0.0  ;;  %v754_v12 = vmul.f32 %v1588_v29, %v2104_v47  ;;  %v724_v30 = vmul.f32 %v2093_v26, %v1597_v34  ;;  %v735_v22 = vmul.f32 %v1600_v35, %v2101_v46  ;;  %v2234_v14 = vld [vmem:[%s1517_s10 + $0x50] sm:$0xff] }
  0x9c   : > { %v780_v27 = vmax.f32 %v771_v19, 0.0  ;;  %v772_v33 = vadd.f32 %v2116_v54, %v761_v24  ;;  %v762_v36 = vadd.f32 %v753_v17, %v742_v63  ;;  %v743_v28 = vadd.f32 %v734_v20, %v723_v15  ;;  %v2240_v24 = vld [vmem:[%s1517_s10 + $0x98] sm:$0xff] }
  0x9d   : > { %v1228_v37 = vadd.f32 -0.234, %v779_v21  ;;  %v744_v25 = vadd.f32 %v735_v22, %v724_v30  ;;  %v755_v29 = vmul.f32 %v1608_v40, %v2104_v47  ;;  %v725_v34 = vmul.f32 %v2093_v26, %v1611_v41  ;;  %v2250_v22 = vld [vmem:[%s1517_s10 + $0x58] sm:$0xff] }
  0x9e   : > { %v1229_v35 = vadd.f32 -0.234, %v780_v27  ;;  %v781_v5 = vmax.f32 %v772_v33, 0.0  ;;  %v773_v42 = vadd.f32 %v2116_v54, %v762_v36  ;;  %v763_v43 = vadd.f32 %v754_v12, %v743_v28  ;;  %v2245_v12 = vld [vmem:[%s1517_s10 + $0x10] sm:$0xff]  ;;  %v2255_v28 = vld [vmem:[%s1517_s10 + $0xa0] sm:$0xff] }
  0x9f   : > { %1237 = vst.msk [vmem:[%s1638_s19 + $0x168] sm:$0xff] %vm346_vm0, %v1228_v37  ;;  %v764_v44 = vadd.f32 %v755_v29, %v744_v25  ;;  %v736_v59 = vmul.f32 %v1622_v50, %v2101_v46  ;;  %v756_v40 = vmul.f32 %v1625_v51, %v2104_v47  ;;  %v726_v41 = vmul.f32 %v2093_v26, %v1642_v60 }
  0xa0   : > { %1238 = vst.msk [vmem:[%s1638_s19 + $0x170] sm:$0xff] %vm346_vm0, %v1229_v35  ;;  %v1230_v39 = vadd.f32 -0.234, %v781_v5  ;;  %v782_v18 = vmax.f32 %v773_v42, 0.0  ;;  %v774_v48 = vadd.f32 %v2116_v54, %v763_v43  ;;  %v737_v49 = vmul.f32 %v1645_v61, %v2101_v46  ;;  %v2267_v5 = vld [vmem:[%s1517_s10 + $0x60] sm:$0xff] }
  0xa1   : > { %v775_v50 = vadd.f32 %v2116_v54, %v764_v44  ;;  %v745_v52 = vadd.f32 %v736_v59, %v725_v34  ;;  %v757_v51 = vmul.f32 %v1655_v11, %v2104_v47  ;;  %v727_v60 = vmul.f32 %v2093_v26, %v1661_v23  ;;  %v2262_v34 = vld [vmem:[%s1517_s10 + $0x18] sm:$0xff]  ;;  %v2275_v59 = vld [vmem:[%s1517_s10 + $0xa8] sm:$0xff] }
  0xa2   : > { %1239 = vst.msk [vmem:[%s1638_s19 + $0x178] sm:$0xff] %vm346_vm0, %v1230_v39  ;;  %v1231_v1 = vadd.f32 -0.234, %v782_v18  ;;  %v783_v58 = vmax.f32 %v774_v48, 0.0  ;;  %v746_v55 = vadd.f32 %v737_v49, %v726_v41  ;;  %v738_v61 = vmul.f32 %v1670_v31, %v2101_v46  ;;  %v2280_v41 = vld [vmem:[%s1517_s10 + $0x20] sm:$0xff] }
  0xa3   : > { %v784_v4 = vmax.f32 %v775_v50, 0.0  ;;  %v765_v0 = vadd.f32 %v756_v40, %v745_v52  ;;  %v758_v11 = vmul.f32 %v1673_v32, %v2104_v47  ;;  %v2194_v2 = vstv %s2155_s12  ;;  %v2286_v50 = vld [vmem:[%s1517_s10 + $0x68] sm:$0xff] }
  0xa4   : > { %1240 = vst.msk [vmem:[%s1638_s19 + $0x180] sm:$0xff] %vm346_vm0, %v1231_v1  ;;  %v1232_v23 = vadd.f32 -0.234, %v783_v58  ;;  %v766_v26 = vadd.f32 %v757_v51, %v746_v55  ;;  %v747_v3 = vadd.f32 %v738_v61, %v727_v60  ;;  %v809_v31 = vmul.f32 %v2199_v56, %v2194_v2  ;;  %v2293_v60 = vld [vmem:[%s1517_s10 + $0xb0] sm:$0xff]  ;;  %v2298_v58 = vld [vmem:[%s1517_s10 + $0x28] sm:$0xff] }
  0xa5   : > { %v1233_v46 = vadd.f32 -0.234, %v784_v4  ;;  %v776_v32 = vadd.f32 %v2116_v54, %v765_v0  ;;  %v2205_v47 = vstv %s2158_s15  ;;  %v2208_v57 = vstv %s2164_s17  ;;  %v2303_v61 = vld [vmem:[%s1517_s10 + $0x70] sm:$0xff] }
  0xa6   : > { %1241 = vst.msk [vmem:[%s1638_s19 + $0x188] sm:$0xff] %vm346_vm0, %v1232_v23  ;;  %v777_v62 = vadd.f32 %v2116_v54, %v766_v26  ;;  %v767_v38 = vadd.f32 %v758_v11, %v747_v3  ;;  %v820_v53 = vmul.f32 %v2214_v7, %v2205_v47  ;;  %v840_v8 = vmul.f32 %v2219_v6, %v2208_v57 }
  0xa7   : > { %1242 = vst.msk [vmem:[%s1638_s19 + $0x190] sm:$0xff] %vm346_vm0, %v1233_v46  ;;  %v785_v45 = vmax.f32 %v776_v32, 0.0  ;;  %v2226_v10 = vstv %s2175_s18  ;;  %v810_v13 = vmul.f32 %v2229_v9, %v2194_v2  ;;  %v821_v16 = vmul.f32 %v2234_v14, %v2205_v47  ;;  %v2313_v46 = vld [vmem:[%s1517_s10 + $0xb8] sm:$0xff] }
  0xa8   : > { %v786_v17 = vmax.f32 %v777_v62, 0.0  ;;  %v778_v15 = vadd.f32 %v2116_v54, %v767_v38  ;;  %v829_v19 = vadd.f32 %v820_v53, %v809_v31  ;;  %v841_v63 = vmul.f32 %v2240_v24, %v2208_v57  ;;  %v2318_v62 = vld [vmem:[%s1517_s10 + $0x30] sm:$0xff] }
  0xa9   : > { %v1234_v20 = vadd.f32 -0.234, %v785_v45  ;;  %v830_v21 = vadd.f32 %v821_v16, %v810_v13  ;;  %v811_v30 = vmul.f32 %v2245_v12, %v2194_v2  ;;  %v822_v54 = vmul.f32 %v2250_v22, %v2205_v47 }
  0xaa   : > { %v1235_v27 = vadd.f32 -0.234, %v786_v17  ;;  %v787_v33 = vmax.f32 %v778_v15, 0.0  ;;  %v849_v36 = vadd.f32 %v840_v8, %v829_v19  ;;  %v842_v37 = vmul.f32 %v2255_v28, %v2208_v57  ;;  %v2328_v17 = vld [vmem:[%s1517_s10 + $0x78] sm:$0xff]  ;;  %v2333_v19 = vld [vmem:[%s1517_s10 + $0xc0] sm:$0xff] }
  0xab   : > { %1243 = vst.msk [vmem:[%s1638_s19 + $0x198] sm:$0xff] %vm346_vm0, %v1234_v20  ;;  %v850_v25 = vadd.f32 %v841_v63, %v830_v21  ;;  %v831_v29 = vadd.f32 %v822_v54, %v811_v30  ;;  %v812_v35 = vmul.f32 %v2262_v34, %v2194_v2  ;;  %v823_v42 = vmul.f32 %v2267_v5, %v2205_v47  ;;  %v2338_v20 = vld [vmem:[%s1517_s10 + $0x38] sm:$0xff] }
  0xac   : > { %1244 = vst.msk [vmem:[%s1638_s19 + $0x1a0] sm:$0xff] %vm346_vm0, %v1235_v27  ;;  %v1236_v43 = vadd.f32 -0.234, %v787_v33  ;;  %v860_v44 = vadd.f32 %v2226_v10, %v849_v36  ;;  %v843_v40 = vmul.f32 %v2275_v59, %v2208_v57  ;;  %v813_v39 = vmul.f32 %v2280_v41, %v2194_v2  ;;  %v2348_v33 = vld [vmem:[%s1517_s10 + $0x80] sm:$0xff] }
  0xad   : > { %v861_v18 = vadd.f32 %v2226_v10, %v850_v25  ;;  %v851_v48 = vadd.f32 %v842_v37, %v831_v29  ;;  %v832_v49 = vadd.f32 %v823_v42, %v812_v35  ;;  %v824_v52 = vmul.f32 %v2286_v50, %v2205_v47  ;;  %v2354_v29 = vld [vmem:[%s1517_s10 + $0xc8] sm:$0xff]  ;;  %v2359_v42 = vld [vmem:[%s1517_s10 + $0x40] sm:$0x3] }
  0xae   : > { %1245 = vst.msk [vmem:[%s1638_s19 + $0x1a8] sm:$0x3] %vm355_vm1, %v1236_v43  ;;  %v869_v51 = vmax.f32 %v860_v44, 0.0  ;;  %v844_v1 = vmul.f32 %v2293_v60, %v2208_v57  ;;  %v814_v55 = vmul.f32 %v2298_v58, %v2194_v2  ;;  %v825_v4 = vmul.f32 %v2303_v61, %v2205_v47 }
  0xaf   : > { %v870_v0 = vmax.f32 %v861_v18, 0.0  ;;  %v862_v11 = vadd.f32 %v2226_v10, %v851_v48  ;;  %v852_v23 = vadd.f32 %v843_v40, %v832_v49  ;;  %v833_v26 = vadd.f32 %v824_v52, %v813_v39  ;;  %v2366_v18 = vld [vmem:[%s1517_s10 + $0x88] sm:$0x3] }
  0xb0   : > { %v1250_v3 = vadd.f32 -0.234, %v869_v51  ;;  %v834_v31 = vadd.f32 %v825_v4, %v814_v55  ;;  %v845_v32 = vmul.f32 %v2313_v46, %v2208_v57  ;;  %v815_v38 = vmul.f32 %v2318_v62, %v2194_v2  ;;  %v2371_v51 = vld [vmem:[%s1517_s10 + $0xd0] sm:$0x3] }
  0xb1   : > { %v1251_v53 = vadd.f32 -0.234, %v870_v0  ;;  %v871_v8 = vmax.f32 %v862_v11, 0.0  ;;  %v863_v45 = vadd.f32 %v2226_v10, %v852_v23  ;;  %v853_v13 = vadd.f32 %v844_v1, %v833_v26 }
  0xb2   : > { %1259 = vst.msk [vmem:[%s1638_s19 + $0x1b0] sm:$0xff] %vm346_vm0, %v1250_v3  ;;  %v854_v16 = vadd.f32 %v845_v32, %v834_v31  ;;  %v826_v15 = vmul.f32 %v2328_v17, %v2205_v47  ;;  %v846_v63 = vmul.f32 %v2333_v19, %v2208_v57  ;;  %v816_v21 = vmul.f32 %v2338_v20, %v2194_v2 }
  0xb3   : > { %1260 = vst.msk [vmem:[%s1638_s19 + $0x1b8] sm:$0xff] %vm346_vm0, %v1251_v53  ;;  %v1252_v30 = vadd.f32 -0.234, %v871_v8  ;;  %v872_v54 = vmax.f32 %v863_v45, 0.0  ;;  %v864_v27 = vadd.f32 %v2226_v10, %v853_v13  ;;  %v827_v36 = vmul.f32 %v2348_v33, %v2205_v47 }
  0xb4   : > { %v865_v37 = vadd.f32 %v2226_v10, %v854_v16  ;;  %v835_v25 = vadd.f32 %v826_v15, %v815_v38  ;;  %v847_v35 = vmul.f32 %v2354_v29, %v2208_v57  ;;  %v817_v43 = vmul.f32 %v2359_v42, %v2194_v2 }
  0xb5   : > { %1261 = vst.msk [vmem:[%s1638_s19 + $0x1c0] sm:$0xff] %vm346_vm0, %v1252_v30  ;;  %v1253_v44 = vadd.f32 -0.234, %v872_v54  ;;  %v873_v40 = vmax.f32 %v864_v27, 0.0  ;;  %v836_v39 = vadd.f32 %v827_v36, %v816_v21  ;;  %v828_v48 = vmul.f32 %v2366_v18, %v2205_v47 }
  0xb6   : > { %v874_v49 = vmax.f32 %v865_v37, 0.0  ;;  %v855_v52 = vadd.f32 %v846_v63, %v835_v25  ;;  %v848_v2 = vmul.f32 %v2371_v51, %v2208_v57  ;;  %v2376_v1 = vstv %s2307_s20 }
  0xb7   : > { %1262 = vst.msk [vmem:[%s1638_s19 + $0x1c8] sm:$0xff] %vm346_vm0, %v1253_v44  ;;  %v1254_v55 = vadd.f32 -0.234, %v873_v40  ;;  %v856_v4 = vadd.f32 %v847_v35, %v836_v39  ;;  %v837_v0 = vadd.f32 %v828_v48, %v817_v43  ;;  %v899_v11 = vmul.f32 %v2199_v56, %v2376_v1 }
  0xb8   : > { %v1255_v47 = vadd.f32 -0.234, %v874_v49  ;;  %v866_v23 = vadd.f32 %v2226_v10, %v855_v52  ;;  %v2384_v26 = vstv %s2310_s21  ;;  %v2387_v3 = vstv %s2322_s22 }
  0xb9   : > { %1263 = vst.msk [vmem:[%s1638_s19 + $0x1d0] sm:$0xff] %vm346_vm0, %v1254_v55  ;;  %v867_v57 = vadd.f32 %v2226_v10, %v856_v4  ;;  %v857_v31 = vadd.f32 %v848_v2, %v837_v0  ;;  %v910_v32 = vmul.f32 %v2214_v7, %v2384_v26  ;;  %v930_v38 = vmul.f32 %v2219_v6, %v2387_v3 }
  0xba   : > { %1264 = vst.msk [vmem:[%s1638_s19 + $0x1d8] sm:$0xff] %vm346_vm0, %v1255_v47  ;;  %v875_v56 = vmax.f32 %v866_v23, 0.0  ;;  %v2399_v53 = vstv %s2342_s23  ;;  %v900_v8 = vmul.f32 %v2229_v9, %v2376_v1  ;;  %v911_v45 = vmul.f32 %v2234_v14, %v2384_v26 }
  0xbb   : > { %v876_v13 = vmax.f32 %v867_v57, 0.0  ;;  %v868_v16 = vadd.f32 %v2226_v10, %v857_v31  ;;  %v919_v7 = vadd.f32 %v910_v32, %v899_v11  ;;  %v931_v6 = vmul.f32 %v2240_v24, %v2387_v3 }
  0xbc   : > { %v1256_v15 = vadd.f32 -0.234, %v875_v56  ;;  %v920_v63 = vadd.f32 %v911_v45, %v900_v8  ;;  %v901_v21 = vmul.f32 %v2245_v12, %v2376_v1  ;;  %v912_v30 = vmul.f32 %v2250_v22, %v2384_v26 }
  0xbd   : > { %v1257_v9 = vadd.f32 -0.234, %v876_v13  ;;  %v877_v54 = vmax.f32 %v868_v16, 0.0  ;;  %v939_v27 = vadd.f32 %v930_v38, %v919_v7  ;;  %v932_v10 = vmul.f32 %v2255_v28, %v2387_v3 }
  0xbe   : > { %1265 = vst.msk [vmem:[%s1638_s19 + $0x1e0] sm:$0xff] %vm346_vm0, %v1256_v15  ;;  %v940_v14 = vadd.f32 %v931_v6, %v920_v63  ;;  %v921_v36 = vadd.f32 %v912_v30, %v901_v21  ;;  %v902_v24 = vmul.f32 %v2262_v34, %v2376_v1  ;;  %v913_v12 = vmul.f32 %v2267_v5, %v2384_v26 }
  0xbf   : > { %1266 = vst.msk [vmem:[%s1638_s19 + $0x1e8] sm:$0xff] %vm346_vm0, %v1257_v9  ;;  %v1258_v22 = vadd.f32 -0.234, %v877_v54  ;;  %v950_v37 = vadd.f32 %v2399_v53, %v939_v27  ;;  %v933_v25 = vmul.f32 %v2275_v59, %v2387_v3  ;;  %v903_v28 = vmul.f32 %v2280_v41, %v2376_v1 }
  0xc0   : > { %v951_v35 = vadd.f32 %v2399_v53, %v940_v14  ;;  %v941_v43 = vadd.f32 %v932_v10, %v921_v36  ;;  %v922_v44 = vadd.f32 %v913_v12, %v902_v24  ;;  %v914_v34 = vmul.f32 %v2286_v50, %v2384_v26 }
  0xc1   : > { %1267 = vst.msk [vmem:[%s1638_s19 + $0x1f0] sm:$0x3] %vm355_vm1, %v1258_v22  ;;  %v959_v5 = vmax.f32 %v950_v37, 0.0  ;;  %v934_v40 = vmul.f32 %v2293_v60, %v2387_v3  ;;  %v904_v59 = vmul.f32 %v2298_v58, %v2376_v1  ;;  %v915_v41 = vmul.f32 %v2303_v61, %v2384_v26 }
  0xc2   : > { %v960_v39 = vmax.f32 %v951_v35, 0.0  ;;  %v952_v48 = vadd.f32 %v2399_v53, %v941_v43  ;;  %v942_v49 = vadd.f32 %v933_v25, %v922_v44  ;;  %v923_v52 = vadd.f32 %v914_v34, %v903_v28 }
  0xc3   : > { %v1272_v50 = vadd.f32 -0.234, %v959_v5  ;;  %v924_v2 = vadd.f32 %v915_v41, %v904_v59  ;;  %v935_v55 = vmul.f32 %v2313_v46, %v2387_v3  ;;  %v905_v60 = vmul.f32 %v2318_v62, %v2376_v1 }
  0xc4   : > { %v1273_v4 = vadd.f32 -0.234, %v960_v39  ;;  %v961_v0 = vmax.f32 %v952_v48, 0.0  ;;  %v953_v58 = vadd.f32 %v2399_v53, %v942_v49  ;;  %v943_v61 = vadd.f32 %v934_v40, %v923_v52 }
  0xc5   : > { %1281 = vst.msk [vmem:[%s1638_s19 + $0x1f8] sm:$0xff] %vm346_vm0, %v1272_v50  ;;  %v944_v11 = vadd.f32 %v935_v55, %v924_v2  ;;  %v916_v47 = vmul.f32 %v2328_v17, %v2384_v26  ;;  %v936_v23 = vmul.f32 %v2333_v19, %v2387_v3  ;;  %v906_v46 = vmul.f32 %v2338_v20, %v2376_v1 }
  0xc6   : > { %1282 = vst.msk [vmem:[%s1638_s19 + $0x200] sm:$0xff] %vm346_vm0, %v1273_v4  ;;  %v1274_v62 = vadd.f32 -0.234, %v961_v0  ;;  %v962_v57 = vmax.f32 %v953_v58, 0.0  ;;  %v954_v31 = vadd.f32 %v2399_v53, %v943_v61  ;;  %v917_v32 = vmul.f32 %v2348_v33, %v2384_v26 }
  0xc7   : > { %v955_v38 = vadd.f32 %v2399_v53, %v944_v11  ;;  %v925_v56 = vadd.f32 %v916_v47, %v905_v60  ;;  %v937_v17 = vmul.f32 %v2354_v29, %v2387_v3  ;;  %v907_v19 = vmul.f32 %v2359_v42, %v2376_v1 }
  0xc8   : > { %1283 = vst.msk [vmem:[%s1638_s19 + $0x208] sm:$0xff] %vm346_vm0, %v1274_v62  ;;  %v1275_v20 = vadd.f32 -0.234, %v962_v57  ;;  %v963_v8 = vmax.f32 %v954_v31, 0.0  ;;  %v926_v45 = vadd.f32 %v917_v32, %v906_v46  ;;  %v918_v13 = vmul.f32 %v2366_v18, %v2384_v26 }
  0xc9   : > { %v964_v33 = vmax.f32 %v955_v38, 0.0  ;;  %v945_v16 = vadd.f32 %v936_v23, %v925_v56  ;;  %v938_v7 = vmul.f32 %v2371_v51, %v2387_v3 }
  0xca   : > { %1284 = vst.msk [vmem:[%s1638_s19 + $0x210] sm:$0xff] %vm346_vm0, %v1275_v20  ;;  %v1276_v29 = vadd.f32 -0.234, %v963_v8  ;;  %v946_v42 = vadd.f32 %v937_v17, %v926_v45  ;;  %v927_v1 = vadd.f32 %v918_v13, %v907_v19 }
  0xcb   : > { %v1277_v6 = vadd.f32 -0.234, %v964_v33  ;;  %v956_v15 = vadd.f32 %v2399_v53, %v945_v16 }
  0xcc   : > { %1285 = vst.msk [vmem:[%s1638_s19 + $0x218] sm:$0xff] %vm346_vm0, %v1276_v29  ;;  %v957_v18 = vadd.f32 %v2399_v53, %v946_v42  ;;  %v947_v26 = vadd.f32 %v938_v7, %v927_v1 }
  0xcd   : > { %1286 = vst.msk [vmem:[%s1638_s19 + $0x220] sm:$0xff] %vm346_vm0, %v1277_v6  ;;  %v965_v63 = vmax.f32 %v956_v15, 0.0 }
  0xce   : > { %v966_v51 = vmax.f32 %v957_v18, 0.0  ;;  %v958_v3 = vadd.f32 %v2399_v53, %v947_v26 }
  0xcf   : > { %v1278_v21 = vadd.f32 -0.234, %v965_v63 }
  0xd0   : > { %v1279_v30 = vadd.f32 -0.234, %v966_v51  ;;  %v967_v9 = vmax.f32 %v958_v3, 0.0 }
  0xd1   : > { %1287 = vst.msk [vmem:[%s1638_s19 + $0x228] sm:$0xff] %vm346_vm0, %v1278_v21 }
  0xd2   : > { %1288 = vst.msk [vmem:[%s1638_s19 + $0x230] sm:$0xff] %vm346_vm0, %v1279_v30  ;;  %v1280_v54 = vadd.f32 -0.234, %v967_v9 }
  0xd4   : > { %1289 = vst.msk [vmem:[%s1638_s19 + $0x238] sm:$0x3] %vm355_vm1, %v1280_v54 }
  0xd5 PF: > { %s15_s14 = sadd.s32 1, %s1426_s14   ;;  %s2504_s12 = smov %s1422_s13 }
  0xd6   : > { %p12_p4 = scmp.ge.s32.totalorder %s15_s14, 4   ;;  %s2505_s13 = smov %s2507_s16 }
  0xd8   :  { %14 = sbr.rel (!%p12_p4) target bundleno = 3 (0x3), region = 80 }
  0xdd   :  { %1017 = vsyncpa [#allocation3], 1 }
  0xde   :  { %1019 = vsyncpa [#allocation3 + $0x1], 1 }
  0xdf   :  { %1020 = vsyncpa [#allocation5], 1 }

</bundles_post_ra>
